<compile_context>
chip_gen: v5e
topology: v5e:2x2
jax: 0.10.0
libtpu: 0.0.40
codegen_flags: <defaults>
</compile_context>

<pallas_src>
from functools import partial

import jax
import jax.numpy as jnp
from jax.experimental import pallas as pl
from jax.experimental.pallas import tpu as pltpu


# ---------------------------------------------------------------------------
# Shared elementwise math (used by kernel and pure-JAX reference).
# ---------------------------------------------------------------------------
def _layer_norm(x, g, b, eps=1e-5):
    mu = jnp.mean(x, axis=-1, keepdims=True)
    xc = x - mu
    var = jnp.mean(xc * xc, axis=-1, keepdims=True)
    return xc * jax.lax.rsqrt(var + eps) * g + b


def _quick_gelu(x):
    return x * (1.0 / (1.0 + jnp.exp(-1.702 * x)))


# ---------------------------------------------------------------------------
# Pallas kernel: one grid step == one transformer layer.  Activation (B*S, D)
# lives in a persistent VMEM scratch; layer weights are streamed per step.
# Last step additionally does final LN -> EOT pool -> projection -> L2 norm.
# ---------------------------------------------------------------------------
def _clip_text_kernel(
    eot_ref,                           # SMEM (B,) int32: argmax(tokens) per batch row
    x0_ref,                            # (B*S, D) f32: token emb + pos emb
    ln1g_ref, ln1b_ref,                # (1, D) f32
    wqkv_ref, bqkv_ref,                # (D, 3D) bf16, (1, 3D) f32
    wo_ref, bo_ref,                    # (D, D) bf16, (1, D) f32
    ln2g_ref, ln2b_ref,                # (1, D) f32
    wfc_ref, bfc_ref,                  # (D, 4D) bf16, (1, 4D) f32
    wpr_ref, bpr_ref,                  # (4D, D) bf16, (1, D) f32
    lnfg_ref, lnfb_ref,                # (1, D) f32
    tproj_ref,                         # (D, D_emb) bf16
    z_ref,                             # out (B, D_emb) f32
    x_sc,                              # scratch (B*S, D) f32, persists across layers
    *, batch, seq, heads,
):
    layer = pl.program_id(0)
    n_layers = pl.num_programs(0)
    BS, D = x_sc.shape
    hd = D // heads
    scale = 1.0 / float(hd) ** 0.5

    @pl.when(layer == 0)
    def _():
        x_sc[...] = x0_ref[...]

    x = x_sc[...]                                                    # (B*S, D) f32

    # causal additive mask, rebuilt per layer (tiny)
    rows = jax.lax.broadcasted_iota(jnp.int32, (seq, seq), 0)
    cols = jax.lax.broadcasted_iota(jnp.int32, (seq, seq), 1)
    causal = jnp.where(cols <= rows, jnp.float32(0.0), jnp.float32(-1e9))

    # ---- multi-head causal self-attention (fused QKV / out-proj) ----
    h = _layer_norm(x, ln1g_ref[...], ln1b_ref[...])
    qkv = jnp.dot(h.astype(jnp.bfloat16), wqkv_ref[...],
                  preferred_element_type=jnp.float32) + bqkv_ref[...]    # (B*S, 3D) f32

    ctx_rows = []
    for b in range(batch):                                           # tiny static unroll
        r0 = b * seq
        q_b = qkv[r0:r0 + seq, 0:D]
        k_b = qkv[r0:r0 + seq, D:2 * D]
        v_b = qkv[r0:r0 + seq, 2 * D:3 * D]
        head_ctx = []
        for hh in range(heads):                                      # tiny static unroll
            c0 = hh * hd
            q_h = q_b[:, c0:c0 + hd] * scale
            k_h = k_b[:, c0:c0 + hd]
            v_h = v_b[:, c0:c0 + hd]
            s = jax.lax.dot_general(q_h, k_h, (((1,), (1,)), ((), ())),
                                    preferred_element_type=jnp.float32)   # (S, S)
            s = s + causal
            s = s - jnp.max(s, axis=-1, keepdims=True)
            p = jnp.exp(s)
            p = p * pl.reciprocal(jnp.sum(p, axis=-1, keepdims=True), approx=True)
            head_ctx.append(jnp.dot(p, v_h, preferred_element_type=jnp.float32))  # (S, hd)
        ctx_rows.append(jnp.concatenate(head_ctx, axis=-1))          # (S, D)
    ctx = jnp.concatenate(ctx_rows, axis=0)                          # (B*S, D)

    attn = jnp.dot(ctx.astype(jnp.bfloat16), wo_ref[...],
                   preferred_element_type=jnp.float32) + bo_ref[...]
    x = x + attn

    # ---- MLP: Linear -> QuickGELU -> Linear ----
    h2 = _layer_norm(x, ln2g_ref[...], ln2b_ref[...])
    a = jnp.dot(h2.astype(jnp.bfloat16), wfc_ref[...],
                preferred_element_type=jnp.float32) + bfc_ref[...]
    a = _quick_gelu(a)
    m = jnp.dot(a.astype(jnp.bfloat16), wpr_ref[...],
                preferred_element_type=jnp.float32) + bpr_ref[...]
    x = x + m
    x_sc[...] = x                                                    # carry to next layer

    # ---- last layer: final LN, EOT pooling, text projection, L2 normalize ----
    @pl.when(layer == n_layers - 1)
    def _():
        xf = _layer_norm(x, lnfg_ref[...], lnfb_ref[...])            # (B*S, D)
        x_sc[...] = xf
        # EOT pooling via dynamic row slices (indices live in SMEM via scalar prefetch)
        pooled = jnp.concatenate(
            [x_sc[pl.ds(b * seq + eot_ref[b], 1), :] for b in range(batch)], axis=0)  # (B, D)
        z = jnp.dot(pooled.astype(jnp.bfloat16), tproj_ref[...],
                    preferred_element_type=jnp.float32)              # (B, D_emb)
        # TODO(synk): like the PyTorch module, no epsilon in the L2 normalize.
        z = z * jax.lax.rsqrt(jnp.sum(z * z, axis=-1, keepdims=True))
        z_ref[...] = z.astype(z_ref.dtype)


# ---------------------------------------------------------------------------
# Wrapper: FrozenCLIPTextEmbedder.forward (post-tokenization).
# ---------------------------------------------------------------------------
def clip_text_embed(params, tokens, *, num_heads):
    """tokens (B, S) int32 -> z (B, D_emb), L2-normalized."""
    emb, pos = params["emb"], params["pos"]
    V, D = emb.shape
    S = pos.shape[0]
    B = tokens.shape[0]
    L = params["ln1_g"].shape[0]
    D_emb = params["text_proj"].shape[1]
    BS = B * S
    assert D % num_heads == 0

    # token embedding gather + positional embedding (trivial memory-bound prologue).
    x0 = (jnp.take(emb, tokens.reshape(-1), axis=0).reshape(B, S, D)
          + pos[None]).reshape(BS, D).astype(jnp.float32)
    # EOT position == argmax over token ids (CLIP convention), passed via scalar prefetch.
    eot_idx = jnp.argmax(tokens, axis=-1).astype(jnp.int32)          # (B,)

    def lspec(shape):        # per-layer streamed weight (leading layer dim squeezed)
        return pl.BlockSpec((None,) + shape, lambda l, eot, _s=shape: (l,) + (0,) * len(_s))

    def rspec(shape):        # resident across all layer steps
        return pl.BlockSpec(shape, lambda l, eot, _n=len(shape): (0,) * _n)

    grid_spec = pltpu.PrefetchScalarGridSpec(
        num_scalar_prefetch=1,
        grid=(L,),
        in_specs=[
            rspec((BS, D)),                          # x0
            lspec((1, D)), lspec((1, D)),            # ln1 gamma/beta
            lspec((D, 3 * D)), lspec((1, 3 * D)),    # fused QKV
            lspec((D, D)), lspec((1, D)),            # out proj
            lspec((1, D)), lspec((1, D)),            # ln2 gamma/beta
            lspec((D, 4 * D)), lspec((1, 4 * D)),    # mlp fc
            lspec((4 * D, D)), lspec((1, D)),        # mlp proj
            rspec((1, D)), rspec((1, D)),            # final LN
            rspec((D, D_emb)),                       # text projection
        ],
        out_specs=pl.BlockSpec((B, D_emb), lambda l, eot: (0, 0)),
        scratch_shapes=[pltpu.VMEM((BS, D), jnp.float32)],
    )

    kernel = partial(_clip_text_kernel, batch=B, seq=S, heads=num_heads)
    return pl.pallas_call(
        kernel,
        out_shape=jax.ShapeDtypeStruct((B, D_emb), jnp.float32),
        grid_spec=grid_spec,
        compiler_params=pltpu.CompilerParams(dimension_semantics=("arbitrary",)),
    )(eot_idx, x0,
      params["ln1_g"], params["ln1_b"],
      params["w_qkv"], params["b_qkv"], params["w_o"], params["b_o"],
      params["ln2_g"], params["ln2_b"],
      params["w_fc"], params["b_fc"], params["w_pr"], params["b_pr"],
      params["lnf_g"], params["lnf_b"], params["text_proj"])


def clip_text_encode(params, tokens, *, num_heads, n_repeat=1):
    """FrozenCLIPTextEmbedder.encode: 'b 1 d -> b k d' repeat of the normalized embedding."""
    z = clip_text_embed(params, tokens, num_heads=num_heads)
    return jnp.broadcast_to(z[:, None, :], (z.shape[0], n_repeat, z.shape[1]))


# ---------------------------------------------------------------------------
# Parameter construction (small random CLIP-like text encoder, deterministic).
# Matmul weights stored bf16 (f32 accumulation in both kernel and reference).
# ---------------------------------------------------------------------------
def init_clip_text_params(key, *, vocab, ctx, width, heads, layers, embed_dim):
    F = 4 * width
    ks = iter(jax.random.split(key, 24))

    def nrm(shape, std):
        return std * jax.random.normal(next(ks), shape, jnp.float32)

    p = {}
    p["emb"] = nrm((vocab, width), 0.02)
    p["pos"] = nrm((ctx, width), 0.01)
    p["ln1_g"] = 1.0 + nrm((layers, 1, width), 0.05)
    p["ln1_b"] = nrm((layers, 1, width), 0.05)
    p["w_qkv"] = nrm((layers, width, 3 * width), 0.02).astype(jnp.bfloat16)
    p["b_qkv"] = nrm((layers, 1, 3 * width), 0.02)
    p["w_o"] = nrm((layers, width, width), 0.02).astype(jnp.bfloat16)
    p["b_o"] = nrm((layers, 1, width), 0.02)
    p["ln2_g"] = 1.0 + nrm((layers, 1, width), 0.05)
    p["ln2_b"] = nrm((layers, 1, width), 0.05)
    p["w_fc"] = nrm((layers, width, F), 0.02).astype(jnp.bfloat16)
    p["b_fc"] = nrm((layers, 1, F), 0.02)
    p["w_pr"] = nrm((layers, F, width), 0.02).astype(jnp.bfloat16)
    p["b_pr"] = nrm((layers, 1, width), 0.02)
    p["lnf_g"] = 1.0 + nrm((1, width), 0.05)
    p["lnf_b"] = nrm((1, width), 0.05)
    p["text_proj"] = nrm((width, embed_dim), 0.02).astype(jnp.bfloat16)
    return p


# ---------------------------------------------------------------------------
# Pure-JAX reference (faithful to the PyTorch CLIP text encoder semantics;
# same bf16-operand / f32-accumulate matmul convention as the kernel).
# ---------------------------------------------------------------------------
def clip_text_embed_ref(params, tokens, *, num_heads):
    emb, pos = params["emb"], params["pos"]
    B, S = tokens.shape
    D = emb.shape[1]
    L = params["ln1_g"].shape[0]
    H = num_heads
    hd = D // H
    scale = 1.0 / float(hd) ** 0.5

    def mm(a, w):
        return jnp.matmul(a.astype(jnp.bfloat16), w, preferred_element_type=jnp.float32)

    x = jnp.take(emb, tokens, axis=0) + pos[None]                    # (B, S, D) f32
    causal = jnp.where(jnp.arange(S)[None, :] <= jnp.arange(S)[:, None],
                       jnp.float32(0.0), jnp.float32(-1e9))

    for l in range(L):
        h = _layer_norm(x, params["ln1_g"][l], params["ln1_b"][l])
        qkv = mm(h, params["w_qkv"][l]) + params["b_qkv"][l]          # (B, S, 3D)
        q, k, v = qkv[..., :D], qkv[..., D:2 * D], qkv[..., 2 * D:]
        q = q.reshape(B, S, H, hd).transpose(0, 2, 1, 3) * scale
        k = k.reshape(B, S, H, hd).transpose(0, 2, 1, 3)
        v = v.reshape(B, S, H, hd).transpose(0, 2, 1, 3)
        s = jnp.einsum("bhqe,bhke->bhqk", q, k,
                       preferred_element_type=jnp.float32) + causal
        p = jax.nn.softmax(s, axis=-1)
        o = jnp.einsum("bhqk,bhke->bhqe", p, v, preferred_element_type=jnp.float32)
        o = o.transpose(0, 2, 1, 3).reshape(B, S, D)
        x = x + mm(o, params["w_o"][l]) + params["b_o"][l]

        h2 = _layer_norm(x, params["ln2_g"][l], params["ln2_b"][l])
        a = _quick_gelu(mm(h2, params["w_fc"][l]) + params["b_fc"][l])
        x = x + mm(a, params["w_pr"][l]) + params["b_pr"][l]

    xf = _layer_norm(x, params["lnf_g"], params["lnf_b"])
    eot_idx = jnp.argmax(tokens, axis=-1)
    pooled = xf[jnp.arange(B), eot_idx]                               # (B, D)
    z = mm(pooled, params["text_proj"])
    return z / jnp.linalg.norm(z, axis=-1, keepdims=True)


if __name__ == "__main__":
    key = jax.random.PRNGKey(0)
    k_p, k_tok = jax.random.split(key)

    # Small CLIP-like config (real ViT-L/14 text encoder: vocab 49408, ctx 77,
    # width 768, 12 heads, 12 layers).  Width / MLP / embed kept lane-dense (x128).
    B = 2
    V, S, D, H, L, D_EMB = 512, 8, 128, 4, 2, 128

    params = init_clip_text_params(k_p, vocab=V, ctx=S, width=D, heads=H,
                                   layers=L, embed_dim=D_EMB)

    # Deterministic "tokenized text": [SOT, word ids..., EOT, 0 padding].
    SOT, EOT = V - 2, V - 1
    words = jax.random.randint(k_tok, (B, S), 1, SOT)
    pos_idx = jnp.arange(S)[None, :]
    eot_pos = jnp.array([[5], [3]])
    tokens = jnp.where(pos_idx == 0, SOT,
                       jnp.where(pos_idx < eot_pos, words,
                                 jnp.where(pos_idx == eot_pos, EOT, 0))).astype(jnp.int32)

    # forward() via the fused Pallas kernel
    z = jax.block_until_ready(clip_text_embed(params, tokens, num_heads=H))

    # correctness vs pure-JAX reference
    z_ref = clip_text_embed_ref(params, tokens, num_heads=H)
    assert z.shape == (B, D_EMB)
    assert jnp.allclose(jnp.sum(z * z, axis=-1), 1.0, atol=1e-3), "output not L2-normalized"
    assert jnp.allclose(z, z_ref, atol=2e-2, rtol=2e-2), "mismatch vs reference"

    # encode(): b 1 d -> b k d repeat (n_repeat=1 default)
    z_enc = jax.block_until_ready(clip_text_encode(params, tokens, num_heads=H, n_repeat=1))
    assert z_enc.shape == (B, 1, D_EMB)

    print("KERNEL_OK")
</pallas_src>

<mosaic_0001>
module attributes {stable_mosaic.version = 11 : i64} {
  func.func @_clip_text_kernel(%arg0: i32, %arg1: memref<2xi32, #tpu.memory_space<smem>>, %arg2: memref<16x128xf32, #tpu.memory_space<vmem>>, %arg3: memref<1x1x128xf32, #tpu.memory_space<vmem>>, %arg4: memref<1x1x128xf32, #tpu.memory_space<vmem>>, %arg5: memref<1x128x384xbf16, #tpu.memory_space<vmem>>, %arg6: memref<1x1x384xf32, #tpu.memory_space<vmem>>, %arg7: memref<1x128x128xbf16, #tpu.memory_space<vmem>>, %arg8: memref<1x1x128xf32, #tpu.memory_space<vmem>>, %arg9: memref<1x1x128xf32, #tpu.memory_space<vmem>>, %arg10: memref<1x1x128xf32, #tpu.memory_space<vmem>>, %arg11: memref<1x128x512xbf16, #tpu.memory_space<vmem>>, %arg12: memref<1x1x512xf32, #tpu.memory_space<vmem>>, %arg13: memref<1x512x128xbf16, #tpu.memory_space<vmem>>, %arg14: memref<1x1x128xf32, #tpu.memory_space<vmem>>, %arg15: memref<1x128xf32, #tpu.memory_space<vmem>>, %arg16: memref<1x128xf32, #tpu.memory_space<vmem>>, %arg17: memref<128x128xbf16, #tpu.memory_space<vmem>>, %arg18: memref<2x128xf32, #tpu.memory_space<vmem>>, %arg19: memref<16x128xf32, #tpu.memory_space<vmem>>) attributes {dimension_semantics = [#tpu.dimension_semantics<arbitrary>], iteration_bounds = array<i64: 2>, scalar_prefetch = 1 : i64, scratch_operands = 1 : i64, tpu.core_type = #tpu.core_type<tc>, window_params = [{pipeline_mode = #tpu.pipeline_mode<synchronous>, transform_indices = @transform_0, window_bounds = array<i64: 16, 128>}, {transform_indices = @transform_1, window_bounds = array<i64: 1, 1, 128>}, {transform_indices = @transform_2, window_bounds = array<i64: 1, 1, 128>}, {transform_indices = @transform_3, window_bounds = array<i64: 1, 128, 384>}, {transform_indices = @transform_4, window_bounds = array<i64: 1, 1, 384>}, {transform_indices = @transform_5, window_bounds = array<i64: 1, 128, 128>}, {transform_indices = @transform_6, window_bounds = array<i64: 1, 1, 128>}, {transform_indices = @transform_7, window_bounds = array<i64: 1, 1, 128>}, {transform_indices = @transform_8, window_bounds = array<i64: 1, 1, 128>}, {transform_indices = @transform_9, window_bounds = array<i64: 1, 128, 512>}, {transform_indices = @transform_10, window_bounds = array<i64: 1, 1, 512>}, {transform_indices = @transform_11, window_bounds = array<i64: 1, 512, 128>}, {transform_indices = @transform_12, window_bounds = array<i64: 1, 1, 128>}, {pipeline_mode = #tpu.pipeline_mode<synchronous>, transform_indices = @transform_13, window_bounds = array<i64: 1, 128>}, {pipeline_mode = #tpu.pipeline_mode<synchronous>, transform_indices = @transform_14, window_bounds = array<i64: 1, 128>}, {pipeline_mode = #tpu.pipeline_mode<synchronous>, transform_indices = @transform_15, window_bounds = array<i64: 128, 128>}, {pipeline_mode = #tpu.pipeline_mode<synchronous>, transform_indices = @transform_16, window_bounds = array<i64: 2, 128>}]} {
    %c0_i32 = arith.constant 0 : i32
    %0 = arith.cmpi eq, %arg0, %c0_i32 : i32
    %1 = arith.extui %0 : i1 to i32
    %c0_i32_0 = arith.constant 0 : i32
    %2 = arith.cmpi ne, %1, %c0_i32_0 : i32
    scf.if %2 {
      %c0_99 = arith.constant 0 : index
      %c0_100 = arith.constant 0 : index
      %257 = vector.load %arg2[%c0_99, %c0_100] : memref<16x128xf32, #tpu.memory_space<vmem>>, vector<16x128xf32>
      %c0_101 = arith.constant 0 : index
      %c0_102 = arith.constant 0 : index
      %258 = vector.load %arg19[%c0_101, %c0_102] : memref<16x128xf32, #tpu.memory_space<vmem>>, vector<16x128xf32>
      tpu.vector_store %arg19[%c0_101, %c0_102], %257 {strides = array<i32>} : memref<16x128xf32, #tpu.memory_space<vmem>>, vector<16x128xf32>,
    } else {
    }
    %c0 = arith.constant 0 : index
    %c0_1 = arith.constant 0 : index
    %3 = vector.load %arg19[%c0, %c0_1] : memref<16x128xf32, #tpu.memory_space<vmem>>, vector<16x128xf32>
    %4 = tpu.iota {dimensions = array<i32: 0>} : vector<8x8xi32>
    %5 = tpu.iota {dimensions = array<i32: 1>} : vector<8x8xi32>
    %6 = arith.cmpi sle, %5, %4 : vector<8x8xi32>
    %cst = arith.constant 0.000000e+00 : f32
    %cst_2 = arith.constant -1.000000e+09 : f32
    %7 = vector.broadcast %cst : f32 to vector<8x8xf32>
    %8 = vector.broadcast %cst_2 : f32 to vector<8x8xf32>
    %9 = arith.select %6, %7, %8 : vector<8x8xi1>, vector<8x8xf32>
    %c0_3 = arith.constant 0 : index
    %c0_4 = arith.constant 0 : index
    %c0_5 = arith.constant 0 : index
    %10 = vector.load %arg3[%c0_3, %c0_4, %c0_5] : memref<1x1x128xf32, #tpu.memory_space<vmem>>, vector<1x1x128xf32>
    %11 = vector.shape_cast %10 : vector<1x1x128xf32> to vector<1x128xf32>
    %c0_6 = arith.constant 0 : index
    %c0_7 = arith.constant 0 : index
    %c0_8 = arith.constant 0 : index
    %12 = vector.load %arg4[%c0_6, %c0_7, %c0_8] : memref<1x1x128xf32, #tpu.memory_space<vmem>>, vector<1x1x128xf32>
    %13 = vector.shape_cast %12 : vector<1x1x128xf32> to vector<1x128xf32>
    %cst_9 = arith.constant dense<0.000000e+00> : vector<16xf32>
    %14 = vector.multi_reduction <add>, %3, %cst_9 [1] : vector<16x128xf32> to vector<16xf32>
    %15 = vector.shape_cast %14 : vector<16xf32> to vector<16x1xf32>
    %cst_10 = arith.constant 1.280000e+02 : f32
    %16 = vector.broadcast %cst_10 : f32 to vector<16x1xf32>
    %17 = arith.divf %15, %16 : vector<16x1xf32>
    %18 = vector.broadcast %17 : vector<16x1xf32> to vector<16x128xf32>
    %19 = arith.subf %3, %18 : vector<16x128xf32>
    %20 = arith.mulf %19, %19 : vector<16x128xf32>
    %cst_11 = arith.constant dense<0.000000e+00> : vector<16xf32>
    %21 = vector.multi_reduction <add>, %20, %cst_11 [1] : vector<16x128xf32> to vector<16xf32>
    %22 = vector.shape_cast %21 : vector<16xf32> to vector<16x1xf32>
    %cst_12 = arith.constant 1.280000e+02 : f32
    %23 = vector.broadcast %cst_12 : f32 to vector<16x1xf32>
    %24 = arith.divf %22, %23 : vector<16x1xf32>
    %cst_13 = arith.constant 9.99999974E-6 : f32
    %25 = vector.broadcast %cst_13 : f32 to vector<16x1xf32>
    %26 = arith.addf %24, %25 : vector<16x1xf32>
    %27 = math.rsqrt %26 : vector<16x1xf32>
    %28 = vector.broadcast %27 : vector<16x1xf32> to vector<16x128xf32>
    %29 = arith.mulf %19, %28 : vector<16x128xf32>
    %30 = vector.broadcast %11 : vector<1x128xf32> to vector<16x128xf32>
    %31 = arith.mulf %29, %30 : vector<16x128xf32>
    %32 = vector.broadcast %13 : vector<1x128xf32> to vector<16x128xf32>
    %33 = arith.addf %31, %32 : vector<16x128xf32>
    %34 = arith.truncf %33 : vector<16x128xf32> to vector<16x128xbf16>
    %c0_14 = arith.constant 0 : index
    %c0_15 = arith.constant 0 : index
    %c0_16 = arith.constant 0 : index
    %35 = vector.load %arg5[%c0_14, %c0_15, %c0_16] : memref<1x128x384xbf16, #tpu.memory_space<vmem>>, vector<1x128x384xbf16>
    %36 = vector.shape_cast %35 : vector<1x128x384xbf16> to vector<128x384xbf16>
    %cst_17 = arith.constant dense<0.000000e+00> : vector<16x384xf32>
    %37 = tpu.matmul %34, %36, %cst_17 {dimension_numbers = #tpu.dot_dimension_numbers<[1], [0], [0], [1], [0, 0, 1, 1], [], []>} : vector<16x128xbf16>, vector<128x384xbf16>, vector<16x384xf32> -> vector<16x384xf32>
    %c0_18 = arith.constant 0 : index
    %c0_19 = arith.constant 0 : index
    %c0_20 = arith.constant 0 : index
    %38 = vector.load %arg6[%c0_18, %c0_19, %c0_20] : memref<1x1x384xf32, #tpu.memory_space<vmem>>, vector<1x1x384xf32>
    %39 = vector.shape_cast %38 : vector<1x1x384xf32> to vector<1x384xf32>
    %40 = vector.broadcast %39 : vector<1x384xf32> to vector<16x384xf32>
    %41 = arith.addf %37, %40 : vector<16x384xf32>
    %42 = vector.extract_strided_slice %41 {offsets = [0, 0], sizes = [8, 128], strides = [1, 1]} : vector<16x384xf32> to vector<8x128xf32>
    %43 = vector.extract_strided_slice %41 {offsets = [0, 128], sizes = [8, 128], strides = [1, 1]} : vector<16x384xf32> to vector<8x128xf32>
    %44 = vector.extract_strided_slice %41 {offsets = [0, 256], sizes = [8, 128], strides = [1, 1]} : vector<16x384xf32> to vector<8x128xf32>
    %45 = vector.extract_strided_slice %42 {offsets = [0, 0], sizes = [8, 32], strides = [1, 1]} : vector<8x128xf32> to vector<8x32xf32>
    %cst_21 = arith.constant 0.176776692 : f32
    %46 = vector.broadcast %cst_21 : f32 to vector<8x32xf32>
    %47 = arith.mulf %45, %46 : vector<8x32xf32>
    %48 = vector.extract_strided_slice %43 {offsets = [0, 0], sizes = [8, 32], strides = [1, 1]} : vector<8x128xf32> to vector<8x32xf32>
    %49 = vector.extract_strided_slice %44 {offsets = [0, 0], sizes = [8, 32], strides = [1, 1]} : vector<8x128xf32> to vector<8x32xf32>
    %cst_22 = arith.constant dense<0.000000e+00> : vector<8x8xf32>
    %50 = tpu.matmul %47, %48, %cst_22 {dimension_numbers = #tpu.dot_dimension_numbers<[1], [1], [0], [0], [0, 0, 1, 0], [], []>} : vector<8x32xf32>, vector<8x32xf32>, vector<8x8xf32> -> vector<8x8xf32>
    %51 = arith.addf %50, %9 : vector<8x8xf32>
    %cst_23 = arith.constant dense<0xFF800000> : vector<8xf32>
    %52 = vector.multi_reduction <maximumf>, %51, %cst_23 [1] : vector<8x8xf32> to vector<8xf32>
    %53 = vector.shape_cast %52 : vector<8xf32> to vector<8x1xf32>
    %54 = vector.broadcast %53 : vector<8x1xf32> to vector<8x8xf32>
    %55 = arith.subf %51, %54 : vector<8x8xf32>
    %56 = math.exp %55 : vector<8x8xf32>
    %cst_24 = arith.constant dense<0.000000e+00> : vector<8xf32>
    %57 = vector.multi_reduction <add>, %56, %cst_24 [1] : vector<8x8xf32> to vector<8xf32>
    %58 = vector.shape_cast %57 : vector<8xf32> to vector<8x1xf32>
    %59 = tpu.reciprocal %58 {approx = true} : vector<8x1xf32> -> vector<8x1xf32>
    %60 = vector.broadcast %59 : vector<8x1xf32> to vector<8x8xf32>
    %61 = arith.mulf %56, %60 : vector<8x8xf32>
    %cst_25 = arith.constant dense<0.000000e+00> : vector<8x32xf32>
    %62 = tpu.matmul %61, %49, %cst_25 {dimension_numbers = #tpu.dot_dimension_numbers<[1], [0], [0], [1], [0, 0, 1, 1], [], []>} : vector<8x8xf32>, vector<8x32xf32>, vector<8x32xf32> -> vector<8x32xf32>
    %63 = vector.extract_strided_slice %42 {offsets = [0, 32], sizes = [8, 32], strides = [1, 1]} : vector<8x128xf32> to vector<8x32xf32>
    %cst_26 = arith.constant 0.176776692 : f32
    %64 = vector.broadcast %cst_26 : f32 to vector<8x32xf32>
    %65 = arith.mulf %63, %64 : vector<8x32xf32>
    %66 = vector.extract_strided_slice %43 {offsets = [0, 32], sizes = [8, 32], strides = [1, 1]} : vector<8x128xf32> to vector<8x32xf32>
    %67 = vector.extract_strided_slice %44 {offsets = [0, 32], sizes = [8, 32], strides = [1, 1]} : vector<8x128xf32> to vector<8x32xf32>
    %cst_27 = arith.constant dense<0.000000e+00> : vector<8x8xf32>
    %68 = tpu.matmul %65, %66, %cst_27 {dimension_numbers = #tpu.dot_dimension_numbers<[1], [1], [0], [0], [0, 0, 1, 0], [], []>} : vector<8x32xf32>, vector<8x32xf32>, vector<8x8xf32> -> vector<8x8xf32>
    %69 = arith.addf %68, %9 : vector<8x8xf32>
    %cst_28 = arith.constant dense<0xFF800000> : vector<8xf32>
    %70 = vector.multi_reduction <maximumf>, %69, %cst_28 [1] : vector<8x8xf32> to vector<8xf32>
    %71 = vector.shape_cast %70 : vector<8xf32> to vector<8x1xf32>
    %72 = vector.broadcast %71 : vector<8x1xf32> to vector<8x8xf32>
    %73 = arith.subf %69, %72 : vector<8x8xf32>
    %74 = math.exp %73 : vector<8x8xf32>
    %cst_29 = arith.constant dense<0.000000e+00> : vector<8xf32>
    %75 = vector.multi_reduction <add>, %74, %cst_29 [1] : vector<8x8xf32> to vector<8xf32>
    %76 = vector.shape_cast %75 : vector<8xf32> to vector<8x1xf32>
    %77 = tpu.reciprocal %76 {approx = true} : vector<8x1xf32> -> vector<8x1xf32>
    %78 = vector.broadcast %77 : vector<8x1xf32> to vector<8x8xf32>
    %79 = arith.mulf %74, %78 : vector<8x8xf32>
    %cst_30 = arith.constant dense<0.000000e+00> : vector<8x32xf32>
    %80 = tpu.matmul %79, %67, %cst_30 {dimension_numbers = #tpu.dot_dimension_numbers<[1], [0], [0], [1], [0, 0, 1, 1], [], []>} : vector<8x8xf32>, vector<8x32xf32>, vector<8x32xf32> -> vector<8x32xf32>
    %81 = vector.extract_strided_slice %42 {offsets = [0, 64], sizes = [8, 32], strides = [1, 1]} : vector<8x128xf32> to vector<8x32xf32>
    %cst_31 = arith.constant 0.176776692 : f32
    %82 = vector.broadcast %cst_31 : f32 to vector<8x32xf32>
    %83 = arith.mulf %81, %82 : vector<8x32xf32>
    %84 = vector.extract_strided_slice %43 {offsets = [0, 64], sizes = [8, 32], strides = [1, 1]} : vector<8x128xf32> to vector<8x32xf32>
    %85 = vector.extract_strided_slice %44 {offsets = [0, 64], sizes = [8, 32], strides = [1, 1]} : vector<8x128xf32> to vector<8x32xf32>
    %cst_32 = arith.constant dense<0.000000e+00> : vector<8x8xf32>
    %86 = tpu.matmul %83, %84, %cst_32 {dimension_numbers = #tpu.dot_dimension_numbers<[1], [1], [0], [0], [0, 0, 1, 0], [], []>} : vector<8x32xf32>, vector<8x32xf32>, vector<8x8xf32> -> vector<8x8xf32>
    %87 = arith.addf %86, %9 : vector<8x8xf32>
    %cst_33 = arith.constant dense<0xFF800000> : vector<8xf32>
    %88 = vector.multi_reduction <maximumf>, %87, %cst_33 [1] : vector<8x8xf32> to vector<8xf32>
    %89 = vector.shape_cast %88 : vector<8xf32> to vector<8x1xf32>
    %90 = vector.broadcast %89 : vector<8x1xf32> to vector<8x8xf32>
    %91 = arith.subf %87, %90 : vector<8x8xf32>
    %92 = math.exp %91 : vector<8x8xf32>
    %cst_34 = arith.constant dense<0.000000e+00> : vector<8xf32>
    %93 = vector.multi_reduction <add>, %92, %cst_34 [1] : vector<8x8xf32> to vector<8xf32>
    %94 = vector.shape_cast %93 : vector<8xf32> to vector<8x1xf32>
    %95 = tpu.reciprocal %94 {approx = true} : vector<8x1xf32> -> vector<8x1xf32>
    %96 = vector.broadcast %95 : vector<8x1xf32> to vector<8x8xf32>
    %97 = arith.mulf %92, %96 : vector<8x8xf32>
    %cst_35 = arith.constant dense<0.000000e+00> : vector<8x32xf32>
    %98 = tpu.matmul %97, %85, %cst_35 {dimension_numbers = #tpu.dot_dimension_numbers<[1], [0], [0], [1], [0, 0, 1, 1], [], []>} : vector<8x8xf32>, vector<8x32xf32>, vector<8x32xf32> -> vector<8x32xf32>
    %99 = vector.extract_strided_slice %42 {offsets = [0, 96], sizes = [8, 32], strides = [1, 1]} : vector<8x128xf32> to vector<8x32xf32>
    %cst_36 = arith.constant 0.176776692 : f32
    %100 = vector.broadcast %cst_36 : f32 to vector<8x32xf32>
    %101 = arith.mulf %99, %100 : vector<8x32xf32>
    %102 = vector.extract_strided_slice %43 {offsets = [0, 96], sizes = [8, 32], strides = [1, 1]} : vector<8x128xf32> to vector<8x32xf32>
    %103 = vector.extract_strided_slice %44 {offsets = [0, 96], sizes = [8, 32], strides = [1, 1]} : vector<8x128xf32> to vector<8x32xf32>
    %cst_37 = arith.constant dense<0.000000e+00> : vector<8x8xf32>
    %104 = tpu.matmul %101, %102, %cst_37 {dimension_numbers = #tpu.dot_dimension_numbers<[1], [1], [0], [0], [0, 0, 1, 0], [], []>} : vector<8x32xf32>, vector<8x32xf32>, vector<8x8xf32> -> vector<8x8xf32>
    %105 = arith.addf %104, %9 : vector<8x8xf32>
    %cst_38 = arith.constant dense<0xFF800000> : vector<8xf32>
    %106 = vector.multi_reduction <maximumf>, %105, %cst_38 [1] : vector<8x8xf32> to vector<8xf32>
    %107 = vector.shape_cast %106 : vector<8xf32> to vector<8x1xf32>
    %108 = vector.broadcast %107 : vector<8x1xf32> to vector<8x8xf32>
    %109 = arith.subf %105, %108 : vector<8x8xf32>
    %110 = math.exp %109 : vector<8x8xf32>
    %cst_39 = arith.constant dense<0.000000e+00> : vector<8xf32>
    %111 = vector.multi_reduction <add>, %110, %cst_39 [1] : vector<8x8xf32> to vector<8xf32>
    %112 = vector.shape_cast %111 : vector<8xf32> to vector<8x1xf32>
    %113 = tpu.reciprocal %112 {approx = true} : vector<8x1xf32> -> vector<8x1xf32>
    %114 = vector.broadcast %113 : vector<8x1xf32> to vector<8x8xf32>
    %115 = arith.mulf %110, %114 : vector<8x8xf32>
    %cst_40 = arith.constant dense<0.000000e+00> : vector<8x32xf32>
    %116 = tpu.matmul %115, %103, %cst_40 {dimension_numbers = #tpu.dot_dimension_numbers<[1], [0], [0], [1], [0, 0, 1, 1], [], []>} : vector<8x8xf32>, vector<8x32xf32>, vector<8x32xf32> -> vector<8x32xf32>
    %117 = tpu.concatenate %62, %80, %98, %116 in 1 : vector<8x32xf32>, vector<8x32xf32>, vector<8x32xf32>, vector<8x32xf32> -> vector<8x128xf32>
    %118 = vector.extract_strided_slice %41 {offsets = [8, 0], sizes = [8, 128], strides = [1, 1]} : vector<16x384xf32> to vector<8x128xf32>
    %119 = vector.extract_strided_slice %41 {offsets = [8, 128], sizes = [8, 128], strides = [1, 1]} : vector<16x384xf32> to vector<8x128xf32>
    %120 = vector.extract_strided_slice %41 {offsets = [8, 256], sizes = [8, 128], strides = [1, 1]} : vector<16x384xf32> to vector<8x128xf32>
    %121 = vector.extract_strided_slice %118 {offsets = [0, 0], sizes = [8, 32], strides = [1, 1]} : vector<8x128xf32> to vector<8x32xf32>
    %cst_41 = arith.constant 0.176776692 : f32
    %122 = vector.broadcast %cst_41 : f32 to vector<8x32xf32>
    %123 = arith.mulf %121, %122 : vector<8x32xf32>
    %124 = vector.extract_strided_slice %119 {offsets = [0, 0], sizes = [8, 32], strides = [1, 1]} : vector<8x128xf32> to vector<8x32xf32>
    %125 = vector.extract_strided_slice %120 {offsets = [0, 0], sizes = [8, 32], strides = [1, 1]} : vector<8x128xf32> to vector<8x32xf32>
    %cst_42 = arith.constant dense<0.000000e+00> : vector<8x8xf32>
    %126 = tpu.matmul %123, %124, %cst_42 {dimension_numbers = #tpu.dot_dimension_numbers<[1], [1], [0], [0], [0, 0, 1, 0], [], []>} : vector<8x32xf32>, vector<8x32xf32>, vector<8x8xf32> -> vector<8x8xf32>
    %127 = arith.addf %126, %9 : vector<8x8xf32>
    %cst_43 = arith.constant dense<0xFF800000> : vector<8xf32>
    %128 = vector.multi_reduction <maximumf>, %127, %cst_43 [1] : vector<8x8xf32> to vector<8xf32>
    %129 = vector.shape_cast %128 : vector<8xf32> to vector<8x1xf32>
    %130 = vector.broadcast %129 : vector<8x1xf32> to vector<8x8xf32>
    %131 = arith.subf %127, %130 : vector<8x8xf32>
    %132 = math.exp %131 : vector<8x8xf32>
    %cst_44 = arith.constant dense<0.000000e+00> : vector<8xf32>
    %133 = vector.multi_reduction <add>, %132, %cst_44 [1] : vector<8x8xf32> to vector<8xf32>
    %134 = vector.shape_cast %133 : vector<8xf32> to vector<8x1xf32>
    %135 = tpu.reciprocal %134 {approx = true} : vector<8x1xf32> -> vector<8x1xf32>
    %136 = vector.broadcast %135 : vector<8x1xf32> to vector<8x8xf32>
    %137 = arith.mulf %132, %136 : vector<8x8xf32>
    %cst_45 = arith.constant dense<0.000000e+00> : vector<8x32xf32>
    %138 = tpu.matmul %137, %125, %cst_45 {dimension_numbers = #tpu.dot_dimension_numbers<[1], [0], [0], [1], [0, 0, 1, 1], [], []>} : vector<8x8xf32>, vector<8x32xf32>, vector<8x32xf32> -> vector<8x32xf32>
    %139 = vector.extract_strided_slice %118 {offsets = [0, 32], sizes = [8, 32], strides = [1, 1]} : vector<8x128xf32> to vector<8x32xf32>
    %cst_46 = arith.constant 0.176776692 : f32
    %140 = vector.broadcast %cst_46 : f32 to vector<8x32xf32>
    %141 = arith.mulf %139, %140 : vector<8x32xf32>
    %142 = vector.extract_strided_slice %119 {offsets = [0, 32], sizes = [8, 32], strides = [1, 1]} : vector<8x128xf32> to vector<8x32xf32>
    %143 = vector.extract_strided_slice %120 {offsets = [0, 32], sizes = [8, 32], strides = [1, 1]} : vector<8x128xf32> to vector<8x32xf32>
    %cst_47 = arith.constant dense<0.000000e+00> : vector<8x8xf32>
    %144 = tpu.matmul %141, %142, %cst_47 {dimension_numbers = #tpu.dot_dimension_numbers<[1], [1], [0], [0], [0, 0, 1, 0], [], []>} : vector<8x32xf32>, vector<8x32xf32>, vector<8x8xf32> -> vector<8x8xf32>
    %145 = arith.addf %144, %9 : vector<8x8xf32>
    %cst_48 = arith.constant dense<0xFF800000> : vector<8xf32>
    %146 = vector.multi_reduction <maximumf>, %145, %cst_48 [1] : vector<8x8xf32> to vector<8xf32>
    %147 = vector.shape_cast %146 : vector<8xf32> to vector<8x1xf32>
    %148 = vector.broadcast %147 : vector<8x1xf32> to vector<8x8xf32>
    %149 = arith.subf %145, %148 : vector<8x8xf32>
    %150 = math.exp %149 : vector<8x8xf32>
    %cst_49 = arith.constant dense<0.000000e+00> : vector<8xf32>
    %151 = vector.multi_reduction <add>, %150, %cst_49 [1] : vector<8x8xf32> to vector<8xf32>
    %152 = vector.shape_cast %151 : vector<8xf32> to vector<8x1xf32>
    %153 = tpu.reciprocal %152 {approx = true} : vector<8x1xf32> -> vector<8x1xf32>
    %154 = vector.broadcast %153 : vector<8x1xf32> to vector<8x8xf32>
    %155 = arith.mulf %150, %154 : vector<8x8xf32>
    %cst_50 = arith.constant dense<0.000000e+00> : vector<8x32xf32>
    %156 = tpu.matmul %155, %143, %cst_50 {dimension_numbers = #tpu.dot_dimension_numbers<[1], [0], [0], [1], [0, 0, 1, 1], [], []>} : vector<8x8xf32>, vector<8x32xf32>, vector<8x32xf32> -> vector<8x32xf32>
    %157 = vector.extract_strided_slice %118 {offsets = [0, 64], sizes = [8, 32], strides = [1, 1]} : vector<8x128xf32> to vector<8x32xf32>
    %cst_51 = arith.constant 0.176776692 : f32
    %158 = vector.broadcast %cst_51 : f32 to vector<8x32xf32>
    %159 = arith.mulf %157, %158 : vector<8x32xf32>
    %160 = vector.extract_strided_slice %119 {offsets = [0, 64], sizes = [8, 32], strides = [1, 1]} : vector<8x128xf32> to vector<8x32xf32>
    %161 = vector.extract_strided_slice %120 {offsets = [0, 64], sizes = [8, 32], strides = [1, 1]} : vector<8x128xf32> to vector<8x32xf32>
    %cst_52 = arith.constant dense<0.000000e+00> : vector<8x8xf32>
    %162 = tpu.matmul %159, %160, %cst_52 {dimension_numbers = #tpu.dot_dimension_numbers<[1], [1], [0], [0], [0, 0, 1, 0], [], []>} : vector<8x32xf32>, vector<8x32xf32>, vector<8x8xf32> -> vector<8x8xf32>
    %163 = arith.addf %162, %9 : vector<8x8xf32>
    %cst_53 = arith.constant dense<0xFF800000> : vector<8xf32>
    %164 = vector.multi_reduction <maximumf>, %163, %cst_53 [1] : vector<8x8xf32> to vector<8xf32>
    %165 = vector.shape_cast %164 : vector<8xf32> to vector<8x1xf32>
    %166 = vector.broadcast %165 : vector<8x1xf32> to vector<8x8xf32>
    %167 = arith.subf %163, %166 : vector<8x8xf32>
    %168 = math.exp %167 : vector<8x8xf32>
    %cst_54 = arith.constant dense<0.000000e+00> : vector<8xf32>
    %169 = vector.multi_reduction <add>, %168, %cst_54 [1] : vector<8x8xf32> to vector<8xf32>
    %170 = vector.shape_cast %169 : vector<8xf32> to vector<8x1xf32>
    %171 = tpu.reciprocal %170 {approx = true} : vector<8x1xf32> -> vector<8x1xf32>
    %172 = vector.broadcast %171 : vector<8x1xf32> to vector<8x8xf32>
    %173 = arith.mulf %168, %172 : vector<8x8xf32>
    %cst_55 = arith.constant dense<0.000000e+00> : vector<8x32xf32>
    %174 = tpu.matmul %173, %161, %cst_55 {dimension_numbers = #tpu.dot_dimension_numbers<[1], [0], [0], [1], [0, 0, 1, 1], [], []>} : vector<8x8xf32>, vector<8x32xf32>, vector<8x32xf32> -> vector<8x32xf32>
    %175 = vector.extract_strided_slice %118 {offsets = [0, 96], sizes = [8, 32], strides = [1, 1]} : vector<8x128xf32> to vector<8x32xf32>
    %cst_56 = arith.constant 0.176776692 : f32
    %176 = vector.broadcast %cst_56 : f32 to vector<8x32xf32>
    %177 = arith.mulf %175, %176 : vector<8x32xf32>
    %178 = vector.extract_strided_slice %119 {offsets = [0, 96], sizes = [8, 32], strides = [1, 1]} : vector<8x128xf32> to vector<8x32xf32>
    %179 = vector.extract_strided_slice %120 {offsets = [0, 96], sizes = [8, 32], strides = [1, 1]} : vector<8x128xf32> to vector<8x32xf32>
    %cst_57 = arith.constant dense<0.000000e+00> : vector<8x8xf32>
    %180 = tpu.matmul %177, %178, %cst_57 {dimension_numbers = #tpu.dot_dimension_numbers<[1], [1], [0], [0], [0, 0, 1, 0], [], []>} : vector<8x32xf32>, vector<8x32xf32>, vector<8x8xf32> -> vector<8x8xf32>
    %181 = arith.addf %180, %9 : vector<8x8xf32>
    %cst_58 = arith.constant dense<0xFF800000> : vector<8xf32>
    %182 = vector.multi_reduction <maximumf>, %181, %cst_58 [1] : vector<8x8xf32> to vector<8xf32>
    %183 = vector.shape_cast %182 : vector<8xf32> to vector<8x1xf32>
    %184 = vector.broadcast %183 : vector<8x1xf32> to vector<8x8xf32>
    %185 = arith.subf %181, %184 : vector<8x8xf32>
    %186 = math.exp %185 : vector<8x8xf32>
    %cst_59 = arith.constant dense<0.000000e+00> : vector<8xf32>
    %187 = vector.multi_reduction <add>, %186, %cst_59 [1] : vector<8x8xf32> to vector<8xf32>
    %188 = vector.shape_cast %187 : vector<8xf32> to vector<8x1xf32>
    %189 = tpu.reciprocal %188 {approx = true} : vector<8x1xf32> -> vector<8x1xf32>
    %190 = vector.broadcast %189 : vector<8x1xf32> to vector<8x8xf32>
    %191 = arith.mulf %186, %190 : vector<8x8xf32>
    %cst_60 = arith.constant dense<0.000000e+00> : vector<8x32xf32>
    %192 = tpu.matmul %191, %179, %cst_60 {dimension_numbers = #tpu.dot_dimension_numbers<[1], [0], [0], [1], [0, 0, 1, 1], [], []>} : vector<8x8xf32>, vector<8x32xf32>, vector<8x32xf32> -> vector<8x32xf32>
    %193 = tpu.concatenate %138, %156, %174, %192 in 1 : vector<8x32xf32>, vector<8x32xf32>, vector<8x32xf32>, vector<8x32xf32> -> vector<8x128xf32>
    %194 = tpu.concatenate %117, %193 in 0 : vector<8x128xf32>, vector<8x128xf32> -> vector<16x128xf32>
    %195 = arith.truncf %194 : vector<16x128xf32> to vector<16x128xbf16>
    %c0_61 = arith.constant 0 : index
    %c0_62 = arith.constant 0 : index
    %c0_63 = arith.constant 0 : index
    %196 = vector.load %arg7[%c0_61, %c0_62, %c0_63] : memref<1x128x128xbf16, #tpu.memory_space<vmem>>, vector<1x128x128xbf16>
    %197 = vector.shape_cast %196 : vector<1x128x128xbf16> to vector<128x128xbf16>
    %cst_64 = arith.constant dense<0.000000e+00> : vector<16x128xf32>
    %198 = tpu.matmul %195, %197, %cst_64 {dimension_numbers = #tpu.dot_dimension_numbers<[1], [0], [0], [1], [0, 0, 1, 1], [], []>} : vector<16x128xbf16>, vector<128x128xbf16>, vector<16x128xf32> -> vector<16x128xf32>
    %c0_65 = arith.constant 0 : index
    %c0_66 = arith.constant 0 : index
    %c0_67 = arith.constant 0 : index
    %199 = vector.load %arg8[%c0_65, %c0_66, %c0_67] : memref<1x1x128xf32, #tpu.memory_space<vmem>>, vector<1x1x128xf32>
    %200 = vector.shape_cast %199 : vector<1x1x128xf32> to vector<1x128xf32>
    %201 = vector.broadcast %200 : vector<1x128xf32> to vector<16x128xf32>
    %202 = arith.addf %198, %201 : vector<16x128xf32>
    %203 = arith.addf %3, %202 : vector<16x128xf32>
    %c0_68 = arith.constant 0 : index
    %c0_69 = arith.constant 0 : index
    %c0_70 = arith.constant 0 : index
    %204 = vector.load %arg9[%c0_68, %c0_69, %c0_70] : memref<1x1x128xf32, #tpu.memory_space<vmem>>, vector<1x1x128xf32>
    %205 = vector.shape_cast %204 : vector<1x1x128xf32> to vector<1x128xf32>
    %c0_71 = arith.constant 0 : index
    %c0_72 = arith.constant 0 : index
    %c0_73 = arith.constant 0 : index
    %206 = vector.load %arg10[%c0_71, %c0_72, %c0_73] : memref<1x1x128xf32, #tpu.memory_space<vmem>>, vector<1x1x128xf32>
    %207 = vector.shape_cast %206 : vector<1x1x128xf32> to vector<1x128xf32>
    %cst_74 = arith.constant dense<0.000000e+00> : vector<16xf32>
    %208 = vector.multi_reduction <add>, %203, %cst_74 [1] : vector<16x128xf32> to vector<16xf32>
    %209 = vector.shape_cast %208 : vector<16xf32> to vector<16x1xf32>
    %cst_75 = arith.constant 1.280000e+02 : f32
    %210 = vector.broadcast %cst_75 : f32 to vector<16x1xf32>
    %211 = arith.divf %209, %210 : vector<16x1xf32>
    %212 = vector.broadcast %211 : vector<16x1xf32> to vector<16x128xf32>
    %213 = arith.subf %203, %212 : vector<16x128xf32>
    %214 = arith.mulf %213, %213 : vector<16x128xf32>
    %cst_76 = arith.constant dense<0.000000e+00> : vector<16xf32>
    %215 = vector.multi_reduction <add>, %214, %cst_76 [1] : vector<16x128xf32> to vector<16xf32>
    %216 = vector.shape_cast %215 : vector<16xf32> to vector<16x1xf32>
    %cst_77 = arith.constant 1.280000e+02 : f32
    %217 = vector.broadcast %cst_77 : f32 to vector<16x1xf32>
    %218 = arith.divf %216, %217 : vector<16x1xf32>
    %cst_78 = arith.constant 9.99999974E-6 : f32
    %219 = vector.broadcast %cst_78 : f32 to vector<16x1xf32>
    %220 = arith.addf %218, %219 : vector<16x1xf32>
    %221 = math.rsqrt %220 : vector<16x1xf32>
    %222 = vector.broadcast %221 : vector<16x1xf32> to vector<16x128xf32>
    %223 = arith.mulf %213, %222 : vector<16x128xf32>
    %224 = vector.broadcast %205 : vector<1x128xf32> to vector<16x128xf32>
    %225 = arith.mulf %223, %224 : vector<16x128xf32>
    %226 = vector.broadcast %207 : vector<1x128xf32> to vector<16x128xf32>
    %227 = arith.addf %225, %226 : vector<16x128xf32>
    %228 = arith.truncf %227 : vector<16x128xf32> to vector<16x128xbf16>
    %c0_79 = arith.constant 0 : index
    %c0_80 = arith.constant 0 : index
    %c0_81 = arith.constant 0 : index
    %229 = vector.load %arg11[%c0_79, %c0_80, %c0_81] : memref<1x128x512xbf16, #tpu.memory_space<vmem>>, vector<1x128x512xbf16>
    %230 = vector.shape_cast %229 : vector<1x128x512xbf16> to vector<128x512xbf16>
    %cst_82 = arith.constant dense<0.000000e+00> : vector<16x512xf32>
    %231 = tpu.matmul %228, %230, %cst_82 {dimension_numbers = #tpu.dot_dimension_numbers<[1], [0], [0], [1], [0, 0, 1, 1], [], []>} : vector<16x128xbf16>, vector<128x512xbf16>, vector<16x512xf32> -> vector<16x512xf32>
    %c0_83 = arith.constant 0 : index
    %c0_84 = arith.constant 0 : index
    %c0_85 = arith.constant 0 : index
    %232 = vector.load %arg12[%c0_83, %c0_84, %c0_85] : memref<1x1x512xf32, #tpu.memory_space<vmem>>, vector<1x1x512xf32>
    %233 = vector.shape_cast %232 : vector<1x1x512xf32> to vector<1x512xf32>
    %234 = vector.broadcast %233 : vector<1x512xf32> to vector<16x512xf32>
    %235 = arith.addf %231, %234 : vector<16x512xf32>
    %cst_86 = arith.constant -1.702000e+00 : f32
    %236 = vector.broadcast %cst_86 : f32 to vector<16x512xf32>
    %237 = arith.mulf %236, %235 : vector<16x512xf32>
    %238 = math.exp %237 : vector<16x512xf32>
    %cst_87 = arith.constant 1.000000e+00 : f32
    %239 = vector.broadcast %cst_87 : f32 to vector<16x512xf32>
    %240 = arith.addf %239, %238 : vector<16x512xf32>
    %cst_88 = arith.constant 1.000000e+00 : f32
    %241 = vector.broadcast %cst_88 : f32 to vector<16x512xf32>
    %242 = arith.divf %241, %240 : vector<16x512xf32>
    %243 = arith.mulf %235, %242 : vector<16x512xf32>
    %244 = arith.truncf %243 : vector<16x512xf32> to vector<16x512xbf16>
    %c0_89 = arith.constant 0 : index
    %c0_90 = arith.constant 0 : index
    %c0_91 = arith.constant 0 : index
    %245 = vector.load %arg13[%c0_89, %c0_90, %c0_91] : memref<1x512x128xbf16, #tpu.memory_space<vmem>>, vector<1x512x128xbf16>
    %246 = vector.shape_cast %245 : vector<1x512x128xbf16> to vector<512x128xbf16>
    %cst_92 = arith.constant dense<0.000000e+00> : vector<16x128xf32>
    %247 = tpu.matmul %244, %246, %cst_92 {dimension_numbers = #tpu.dot_dimension_numbers<[1], [0], [0], [1], [0, 0, 1, 1], [], []>} : vector<16x512xbf16>, vector<512x128xbf16>, vector<16x128xf32> -> vector<16x128xf32>
    %c0_93 = arith.constant 0 : index
    %c0_94 = arith.constant 0 : index
    %c0_95 = arith.constant 0 : index
    %248 = vector.load %arg14[%c0_93, %c0_94, %c0_95] : memref<1x1x128xf32, #tpu.memory_space<vmem>>, vector<1x1x128xf32>
    %249 = vector.shape_cast %248 : vector<1x1x128xf32> to vector<1x128xf32>
    %250 = vector.broadcast %249 : vector<1x128xf32> to vector<16x128xf32>
    %251 = arith.addf %247, %250 : vector<16x128xf32>
    %252 = arith.addf %203, %251 : vector<16x128xf32>
    %c0_96 = arith.constant 0 : index
    %c0_97 = arith.constant 0 : index
    %253 = vector.load %arg19[%c0_96, %c0_97] : memref<16x128xf32, #tpu.memory_space<vmem>>, vector<16x128xf32>
    tpu.vector_store %arg19[%c0_96, %c0_97], %252 {strides = array<i32>} : memref<16x128xf32, #tpu.memory_space<vmem>>, vector<16x128xf32>,
    %c1_i32 = arith.constant 1 : i32
    %254 = arith.cmpi eq, %arg0, %c1_i32 : i32
    %255 = arith.extui %254 : i1 to i32
    %c0_i32_98 = arith.constant 0 : i32
    %256 = arith.cmpi ne, %255, %c0_i32_98 : i32
    scf.if %256 {
      %c0_99 = arith.constant 0 : index
      %c0_100 = arith.constant 0 : index
      %257 = vector.load %arg15[%c0_99, %c0_100] : memref<1x128xf32, #tpu.memory_space<vmem>>, vector<1x128xf32>
      %c0_101 = arith.constant 0 : index
      %c0_102 = arith.constant 0 : index
      %258 = vector.load %arg16[%c0_101, %c0_102] : memref<1x128xf32, #tpu.memory_space<vmem>>, vector<1x128xf32>
      %cst_103 = arith.constant dense<0.000000e+00> : vector<16xf32>
      %259 = vector.multi_reduction <add>, %252, %cst_103 [1] : vector<16x128xf32> to vector<16xf32>
      %260 = vector.shape_cast %259 : vector<16xf32> to vector<16x1xf32>
      %cst_104 = arith.constant 1.280000e+02 : f32
      %261 = vector.broadcast %cst_104 : f32 to vector<16x1xf32>
      %262 = arith.divf %260, %261 : vector<16x1xf32>
      %263 = vector.broadcast %262 : vector<16x1xf32> to vector<16x128xf32>
      %264 = arith.subf %252, %263 : vector<16x128xf32>
      %265 = arith.mulf %264, %264 : vector<16x128xf32>
      %cst_105 = arith.constant dense<0.000000e+00> : vector<16xf32>
      %266 = vector.multi_reduction <add>, %265, %cst_105 [1] : vector<16x128xf32> to vector<16xf32>
      %267 = vector.shape_cast %266 : vector<16xf32> to vector<16x1xf32>
      %cst_106 = arith.constant 1.280000e+02 : f32
      %268 = vector.broadcast %cst_106 : f32 to vector<16x1xf32>
      %269 = arith.divf %267, %268 : vector<16x1xf32>
      %cst_107 = arith.constant 9.99999974E-6 : f32
      %270 = vector.broadcast %cst_107 : f32 to vector<16x1xf32>
      %271 = arith.addf %269, %270 : vector<16x1xf32>
      %272 = math.rsqrt %271 : vector<16x1xf32>
      %273 = vector.broadcast %272 : vector<16x1xf32> to vector<16x128xf32>
      %274 = arith.mulf %264, %273 : vector<16x128xf32>
      %275 = vector.broadcast %257 : vector<1x128xf32> to vector<16x128xf32>
      %276 = arith.mulf %274, %275 : vector<16x128xf32>
      %277 = vector.broadcast %258 : vector<1x128xf32> to vector<16x128xf32>
      %278 = arith.addf %276, %277 : vector<16x128xf32>
      %c0_108 = arith.constant 0 : index
      %c0_109 = arith.constant 0 : index
      %279 = vector.load %arg19[%c0_108, %c0_109] : memref<16x128xf32, #tpu.memory_space<vmem>>, vector<16x128xf32>
      tpu.vector_store %arg19[%c0_108, %c0_109], %278 {strides = array<i32>} : memref<16x128xf32, #tpu.memory_space<vmem>>, vector<16x128xf32>,
      %c0_110 = arith.constant 0 : index
      %280 = memref.load %arg1[%c0_110] : memref<2xi32, #tpu.memory_space<smem>>
      %c0_i32_111 = arith.constant 0 : i32
      %281 = arith.addi %c0_i32_111, %280 : i32
      %282 = arith.index_cast %281 : i32 to index
      %c0_112 = arith.constant 0 : index
      %283 = vector.load %arg19[%282, %c0_112] : memref<16x128xf32, #tpu.memory_space<vmem>>, vector<1x128xf32>
      %c1 = arith.constant 1 : index
      %284 = memref.load %arg1[%c1] : memref<2xi32, #tpu.memory_space<smem>>
      %c8_i32 = arith.constant 8 : i32
      %285 = arith.addi %c8_i32, %284 : i32
      %286 = arith.index_cast %285 : i32 to index
      %c0_113 = arith.constant 0 : index
      %287 = vector.load %arg19[%286, %c0_113] : memref<16x128xf32, #tpu.memory_space<vmem>>, vector<1x128xf32>
      %288 = tpu.concatenate %283, %287 in 0 : vector<1x128xf32>, vector<1x128xf32> -> vector<2x128xf32>
      %289 = arith.truncf %288 : vector<2x128xf32> to vector<2x128xbf16>
      %c0_114 = arith.constant 0 : index
      %c0_115 = arith.constant 0 : index
      %290 = vector.load %arg17[%c0_114, %c0_115] : memref<128x128xbf16, #tpu.memory_space<vmem>>, vector<128x128xbf16>
      %cst_116 = arith.constant dense<0.000000e+00> : vector<2x128xf32>
      %291 = tpu.matmul %289, %290, %cst_116 {dimension_numbers = #tpu.dot_dimension_numbers<[1], [0], [0], [1], [0, 0, 1, 1], [], []>} : vector<2x128xbf16>, vector<128x128xbf16>, vector<2x128xf32> -> vector<2x128xf32>
      %292 = arith.mulf %291, %291 : vector<2x128xf32>
      %cst_117 = arith.constant dense<0.000000e+00> : vector<2xf32>
      %293 = vector.multi_reduction <add>, %292, %cst_117 [1] : vector<2x128xf32> to vector<2xf32>
      %294 = vector.shape_cast %293 : vector<2xf32> to vector<2x1xf32>
      %295 = math.rsqrt %294 : vector<2x1xf32>
      %296 = vector.broadcast %295 : vector<2x1xf32> to vector<2x128xf32>
      %297 = arith.mulf %291, %296 : vector<2x128xf32>
      %c0_118 = arith.constant 0 : index
      %c0_119 = arith.constant 0 : index
      %298 = vector.load %arg18[%c0_118, %c0_119] : memref<2x128xf32, #tpu.memory_space<vmem>>, vector<2x128xf32>
      tpu.vector_store %arg18[%c0_118, %c0_119], %297 {strides = array<i32>} : memref<2x128xf32, #tpu.memory_space<vmem>>, vector<2x128xf32>,
    } else {
    }
    return
  }
  func.func @transform_0(%arg0: i32, %arg1: memref<2xi32, #tpu.memory_space<smem>>) -> (i32, i32) {
    %c0_i32 = arith.constant 0 : i32
    %c0_i32_0 = arith.constant 0 : i32
    %c0_i32_1 = arith.constant 0 : i32
    return %c0_i32, %c0_i32_0 : i32, i32
  }
  func.func @transform_1(%arg0: i32, %arg1: memref<2xi32, #tpu.memory_space<smem>>) -> (i32, i32, i32) {
    %c0_i32 = arith.constant 0 : i32
    %c0_i32_0 = arith.constant 0 : i32
    %c0_i32_1 = arith.constant 0 : i32
    return %arg0, %c0_i32, %c0_i32_0 : i32, i32, i32
  }
  func.func @transform_2(%arg0: i32, %arg1: memref<2xi32, #tpu.memory_space<smem>>) -> (i32, i32, i32) {
    %c0_i32 = arith.constant 0 : i32
    %c0_i32_0 = arith.constant 0 : i32
    %c0_i32_1 = arith.constant 0 : i32
    return %arg0, %c0_i32, %c0_i32_0 : i32, i32, i32
  }
  func.func @transform_3(%arg0: i32, %arg1: memref<2xi32, #tpu.memory_space<smem>>) -> (i32, i32, i32) {
    %c0_i32 = arith.constant 0 : i32
    %c0_i32_0 = arith.constant 0 : i32
    %c0_i32_1 = arith.constant 0 : i32
    return %arg0, %c0_i32, %c0_i32_0 : i32, i32, i32
  }
  func.func @transform_4(%arg0: i32, %arg1: memref<2xi32, #tpu.memory_space<smem>>) -> (i32, i32, i32) {
    %c0_i32 = arith.constant 0 : i32
    %c0_i32_0 = arith.constant 0 : i32
    %c0_i32_1 = arith.constant 0 : i32
    return %arg0, %c0_i32, %c0_i32_0 : i32, i32, i32
  }
  func.func @transform_5(%arg0: i32, %arg1: memref<2xi32, #tpu.memory_space<smem>>) -> (i32, i32, i32) {
    %c0_i32 = arith.constant 0 : i32
    %c0_i32_0 = arith.constant 0 : i32
    %c0_i32_1 = arith.constant 0 : i32
    return %arg0, %c0_i32, %c0_i32_0 : i32, i32, i32
  }
  func.func @transform_6(%arg0: i32, %arg1: memref<2xi32, #tpu.memory_space<smem>>) -> (i32, i32, i32) {
    %c0_i32 = arith.constant 0 : i32
    %c0_i32_0 = arith.constant 0 : i32
    %c0_i32_1 = arith.constant 0 : i32
    return %arg0, %c0_i32, %c0_i32_0 : i32, i32, i32
  }
  func.func @transform_7(%arg0: i32, %arg1: memref<2xi32, #tpu.memory_space<smem>>) -> (i32, i32, i32) {
    %c0_i32 = arith.constant 0 : i32
    %c0_i32_0 = arith.constant 0 : i32
    %c0_i32_1 = arith.constant 0 : i32
    return %arg0, %c0_i32, %c0_i32_0 : i32, i32, i32
  }
  func.func @transform_8(%arg0: i32, %arg1: memref<2xi32, #tpu.memory_space<smem>>) -> (i32, i32, i32) {
    %c0_i32 = arith.constant 0 : i32
    %c0_i32_0 = arith.constant 0 : i32
    %c0_i32_1 = arith.constant 0 : i32
    return %arg0, %c0_i32, %c0_i32_0 : i32, i32, i32
  }
  func.func @transform_9(%arg0: i32, %arg1: memref<2xi32, #tpu.memory_space<smem>>) -> (i32, i32, i32) {
    %c0_i32 = arith.constant 0 : i32
    %c0_i32_0 = arith.constant 0 : i32
    %c0_i32_1 = arith.constant 0 : i32
    return %arg0, %c0_i32, %c0_i32_0 : i32, i32, i32
  }
  func.func @transform_10(%arg0: i32, %arg1: memref<2xi32, #tpu.memory_space<smem>>) -> (i32, i32, i32) {
    %c0_i32 = arith.constant 0 : i32
    %c0_i32_0 = arith.constant 0 : i32
    %c0_i32_1 = arith.constant 0 : i32
    return %arg0, %c0_i32, %c0_i32_0 : i32, i32, i32
  }
  func.func @transform_11(%arg0: i32, %arg1: memref<2xi32, #tpu.memory_space<smem>>) -> (i32, i32, i32) {
    %c0_i32 = arith.constant 0 : i32
    %c0_i32_0 = arith.constant 0 : i32
    %c0_i32_1 = arith.constant 0 : i32
    return %arg0, %c0_i32, %c0_i32_0 : i32, i32, i32
  }
  func.func @transform_12(%arg0: i32, %arg1: memref<2xi32, #tpu.memory_space<smem>>) -> (i32, i32, i32) {
    %c0_i32 = arith.constant 0 : i32
    %c0_i32_0 = arith.constant 0 : i32
    %c0_i32_1 = arith.constant 0 : i32
    return %arg0, %c0_i32, %c0_i32_0 : i32, i32, i32
  }
  func.func @transform_13(%arg0: i32, %arg1: memref<2xi32, #tpu.memory_space<smem>>) -> (i32, i32) {
    %c0_i32 = arith.constant 0 : i32
    %c0_i32_0 = arith.constant 0 : i32
    %c0_i32_1 = arith.constant 0 : i32
    return %c0_i32, %c0_i32_0 : i32, i32
  }
  func.func @transform_14(%arg0: i32, %arg1: memref<2xi32, #tpu.memory_space<smem>>) -> (i32, i32) {
    %c0_i32 = arith.constant 0 : i32
    %c0_i32_0 = arith.constant 0 : i32
    %c0_i32_1 = arith.constant 0 : i32
    return %c0_i32, %c0_i32_0 : i32, i32
  }
  func.func @transform_15(%arg0: i32, %arg1: memref<2xi32, #tpu.memory_space<smem>>) -> (i32, i32) {
    %c0_i32 = arith.constant 0 : i32
    %c0_i32_0 = arith.constant 0 : i32
    %c0_i32_1 = arith.constant 0 : i32
    return %c0_i32, %c0_i32_0 : i32, i32
  }
  func.func @transform_16(%arg0: i32, %arg1: memref<2xi32, #tpu.memory_space<smem>>) -> (i32, i32) {
    %c0_i32 = arith.constant 0 : i32
    %c0_i32_0 = arith.constant 0 : i32
    %c0_i32_1 = arith.constant 0 : i32
    return %c0_i32, %c0_i32_0 : i32, i32
  }
}

</mosaic_0001>

<bundles_post_ra>
// kernel: tpu_custom_call.1
= control target key start
LH: loop header
LB: loop body
LE: loop exit
PB: predicated region body
PF: predicated region fallthrough
CT: control target
= control target key end

     0   :  { %s4301_s27 = smov [#allocation4]   ;;  %s5263_s0 = inlined_call_operand.hbm [shape: s32[2], index: 0, kind: input, shape index: {}]   ;;  %s5264_s1 = inlined_call_operand.hbm [shape: f32[16,128], index: 1, kind: input, shape index: {}]   ;;  %s5265_s2 = inlined_call_operand.hbm [shape: f32[2,1,128], index: 2, kind: input, shape index: {}]   ;;  %s5266_s3 = inlined_call_operand.vmem [shape: f32[2,1,128], index: 3, kind: input, shape index: {}]   ;;  %s5267_s4 = inlined_call_operand.hbm [shape: bf16[2,128,384], index: 4, kind: input, shape index: {}]   ;;  %s5268_s5 = inlined_call_operand.hbm [shape: f32[2,1,384], index: 5, kind: input, shape index: {}]   ;;  %s5269_s6 = inlined_call_operand.hbm [shape: bf16[2,128,128], index: 6, kind: input, shape index: {}]   ;;  %s5270_s7 = inlined_call_operand.hbm [shape: f32[2,1,128], index: 7, kind: input, shape index: {}]   ;;  %s5271_s8 = inlined_call_operand.hbm [shape: f32[2,1,128], index: 8, kind: input, shape index: {}]   ;;  %s5272_s9 = inlined_call_operand.hbm [shape: f32[2,1,128], index: 9, kind: input, shape index: {}]   ;;  %s5273_s10 = inlined_call_operand.hbm [shape: bf16[2,128,512], index: 10, kind: input, shape index: {}]   ;;  %s5274_s11 = inlined_call_operand.vmem [shape: f32[2,1,512], index: 11, kind: input, shape index: {}]   ;;  %s5275_s12 = inlined_call_operand.hbm [shape: bf16[2,512,128], index: 12, kind: input, shape index: {}]   ;;  %s5276_s13 = inlined_call_operand.vmem [shape: f32[2,1,128], index: 13, kind: input, shape index: {}]   ;;  %s5277_s14 = inlined_call_operand.vmem [shape: f32[1,128], index: 14, kind: input, shape index: {}]   ;;  %s5278_s15 = inlined_call_operand.vmem [shape: f32[1,128], index: 15, kind: input, shape index: {}]   ;;  %s5279_s16 = inlined_call_operand.hbm [shape: bf16[128,128], index: 16, kind: input, shape index: {}]   ;;  %s5280_s17 = inlined_call_operand.hbm [shape: f32[2,128], index: 17, kind: output, shape index: {}]  }
   0x1   :  { %5298 = sst [smem:[#allocation40_spill]] %s5263_s0 }
   0x2   :  { %5299 = sst [smem:[#allocation41_spill]] %s5264_s1 }
   0x3   :  { %5300 = sst [smem:[#allocation42_spill]] %s5265_s2 }
   0x4   :  { %5301 = sst [smem:[#allocation43_spill]] %s5266_s3 }
   0x5   :  { %5302 = sst [smem:[#allocation44_spill]] %s5274_s11 }
   0x6   :  { %5303 = sst [smem:[#allocation45_spill]] %s5276_s13 }
   0x7   :  { %5304 = sst [smem:[#allocation46_spill]] %s5277_s14 }
   0x8   :  { %5305 = sst [smem:[#allocation47_spill]] %s5278_s15 }
   0x9   :  { %5306 = sst [smem:[#allocation48_spill]] %s5279_s16 }
   0xa   :  { %5307 = sst [smem:[#allocation49_spill]] %s5280_s17 }
   0xb   :  { %s5308_s26 = sld [smem:[#allocation40_spill]] }
  0x11   :  { %s23_s11 = sshll.u32 %s5308_s26, 4  ;;  %s24_s11 = int_to_ptr.hbm [resolvable:$true] %s23_s11 }
  0x12   :  { %26 = dma.hbm_to_smem %s24_s11, 16, %s4301_s27, [#allocation3] }
  0x13   :  { %4251 = dma.done.wait [#allocation3], 16 }
  0x14   :  { %4252 = vsyncadd [#allocation3], 4294967280 }
  0x15   :  { %29 = sfence }
  0x16   :  { %30 = vsyncpa [#allocation6], 0 }
  0x17   :  { %31 = vsyncpa [#allocation9], 0 }
  0x18   :  { %33 = vsyncpa [#allocation9 + $0x1], 0 }
  0x19   :  { %34 = vsyncpa [#allocation12], 0 }
  0x1a   :  { %36 = vsyncpa [#allocation12 + $0x1], 0 }
  0x1b   :  { %37 = vsyncpa [#allocation15], 0 }
  0x1c   :  { %39 = vsyncpa [#allocation15 + $0x1], 0 }
  0x1d   :  { %40 = vsyncpa [#allocation18], 0 }
  0x1e   :  { %42 = vsyncpa [#allocation18 + $0x1], 0 }
  0x1f   :  { %43 = vsyncpa [#allocation21], 0 }
  0x20   :  { %45 = vsyncpa [#allocation21 + $0x1], 0 }
  0x21   :  { %46 = vsyncpa [#allocation7], 0  ;;  %s4411_s28 = smov 0   ;;  %s4413_s29 = smov 0  }
  0x22   :  { %s4415_s11 = smov 0   ;;  %s4417_s0 = smov 0  }
  0x23 LB: > { %5309 = sst [smem:[#allocation33_spill]] %s4291_s29  ;;  %s4430_s30 = sadd.s32 4294967295, %s4299_s0   ;;  %s4299_s0 = sphi %s4417_s0, %s5357_s0   ;;  %s4295_s11 = sphi %s4415_s11, %s5360_s11   ;;  %s4291_s29 = sphi %s4413_s29, %s5359_s29   ;;  %s4287_s28 = sphi %s4411_s28, %s5358_s28  }
  0x24   : > { %5310 = sst [smem:[#allocation34_spill]] %s4295_s11  ;;  %s4433_s18 = sadd.s32 1, %s4299_s0  }
  0x25   : > { %5311 = sst [smem:[#allocation35_spill]] %s4430_s30  ;;  %s77_s19 = ssub.s32 %s4299_s0, %s4433_s18 }
  0x26   : > { %5312 = sst [smem:[#allocation36_spill]] %s4433_s18  ;;  %s80_s1 = sadd.s32 1, %s4295_s11 }
  0x27   : > { %p78_p0 = scmp.eq.s32.totalorder %s77_s19, 0  ;;  %p87_p1 = scmp.ne.s32.totalorder %s4295_s11, %s4291_s29 }
  0x28   : > { %p88_p2 = scmp.eq.s32.totalorder %s4299_s0, 0  ;;  %p93_p3 = scmp.ne.s32.totalorder %s4291_s29, %s4287_s28 }
  0x29   : > { %s4443_s20 = scalar_select %p78_p0, %s4295_s11, %s80_s1  }
  0x2a   : > { %p4445_p4 = por %p88_p2, %p87_p1  ;;  %p94_p5 = scmp.eq.s32.totalorder %s4430_s30, 0 }
  0x2b   : > { %5313 = sst [smem:[#allocation37_spill]] %s4443_s20  ;;  %p3059_p6 = scmp.ge.s32.totalorder %s4299_s0, 1 }
  0x2c   : > { %p474_p7 = scmp.lt.s32.totalorder %s4299_s0, 3  ;;  %p4454_p8 = por %p94_p5, %p93_p3 }
  0x2d   : > { %p3060_p9 = scmp.ne.s32.totalorder %s4430_s30, 0  ;;  %s5319_s16 = sld [smem:[#allocation48_spill]] }
  0x2e   : > { %s5315_s22 = scalar_select %p4454_p8, 1, 0 }
  0x2f   : > { %p4459_p10 = pnand %p3059_p6, %p474_p7  ;;  %s4302_s27 = smov [#allocation22]  }
  0x30   : > { %5316 = sst [smem:[#allocation38_spill]] %s5315_s22  ;;  %s507_s28 = sshll.u32 %s4302_s27, 4  ;;  %s508_s28 = int_to_ptr.vmem [resolvable:$true] %s507_s28 }
  0x31   : > { %s5317_s23 = scalar_select %p4459_p10, 1, 0 }
  0x32   : > { %p3671_p11 = pneg %p4459_p10  ;;  %p3708_p13 = scmp.lt.s32.totalorder %s4299_s0, 2 }
  0x33   : > { %5318 = sst [smem:[#allocation39_spill]] %s5317_s23  ;;  %s505_s26 = sshll.u32 %s5319_s16, 4  ;;  %s506_s26 = int_to_ptr.hbm [resolvable:$true] %s505_s26 }
  0x34   : > { %p4470_p12 = pnand %p3671_p11, %p94_p5  ;;  %s4476_s1 = sand.u32 1, %s4299_s0  }
  0x35   : > { %s5283_s20 = smov 64   ;;  %s5285_s24 = smov 4  }
  0x36   : > { %3677 = dma.hbm_to_vmem [thread:$0]  (!%p4470_p12), %s506_s26, 1024, %s508_s28, [#allocation21], %s5283_s20, %s5283_s20, %s5285_s24  }
  0x37   : > { %p4485_p0 = pnand %p3708_p13, %p4445_p4  ;;  %s4490_s27 = sand.u32 1, %s4295_s11  }
  0x38   : > { %s5322_s2 = sld [smem:[#allocation42_spill]]  ;;  %s524_s14 = scalar_lea.vmem [#allocation8], %s4490_s27 }
  0x39   : > { %s531_s13 = sshll.u32 %s524_s14, 4  ;;  %s5296_s3 = scalar_lea.sflag [#allocation9], %s4476_s1  ;;  %s532_s13 = int_to_ptr.vmem [resolvable:$true] %s531_s13 }
  0x3a   : > { %p4500_p2 = pneg %p4485_p0 }
  0x3e   : > { %s527_s17 = scalar_lea.hbm %s5322_s2, %s4299_s0  ;;  %s3914_s14 = scalar_lea.hbm %s5322_s2, 2 }
  0x3f   : > { %s529_s15 = sshll.u32 %s527_s17, 4  ;;  %s530_s15 = int_to_ptr.hbm [resolvable:$true] %s529_s15 }
  0x40   : > { %s3907_s26 = sshra.s32 %s530_s15, 4  ;;  %s3908_s26 = int_to_ptr.hbm [resolvable:$true] %s3907_s26 }
  0x41   : > { %s3909_s21 = scalar_lea.hbm %s3908_s26, 1  ;;  %p3915_p6 = scmp.lt.s32.totalorder %s3908_s26, %s5322_s2 }
  0x42   : > { %p3910_p1 = scmp.ne.s32.totalorder %s3908_s26, %s3909_s21  ;;  %p3916_p7 = scmp.lt.s32.totalorder %s3914_s14, %s3909_s21 }
  0x44   : > { %p3912_p3 = pnand %p4500_p2, %p3910_p1  ;;  %p3917_p11 = por %p3916_p7, %p3915_p6 }
  0x46   : > { %p3913_p4 = pneg %p3912_p3 }
  0x48   : > { %p3918_p13 = pnand %p3917_p11, %p3913_p4 }
  0x4a   : > { %3921 = shalt.err (!%p3918_p13)
}
  0x4b   : > { %3681 = dma.hbm_to_vmem [thread:$0]  (!%p4485_p0), %s530_s15, 16, %s532_s13, %s5296_s3  }
  0x4c   : > { %s3637_s16 = smul.u32 3, %s4490_s27  ;;  %s613_s22 = scalar_lea.hbm %s5270_s7, %s4299_s0 }
  0x4d   : > { %s3638_s17 = smul.u32 3, %s4299_s0  ;;  %s5294_s29 = scalar_lea.sflag [#allocation12], %s4476_s1 }
  0x4e   : > { %s570_s26 = scalar_lea.vmem [#allocation11], %s3637_s16  ;;  %s3944_s11 = scalar_lea.hbm %s5268_s5, 6 }
  0x4f   : > { %s574_s20 = scalar_lea.hbm %s5268_s5, %s3638_s17  ;;  %s578_s21 = sshll.u32 %s570_s26, 4  ;;  %s579_s21 = int_to_ptr.vmem [resolvable:$true] %s578_s21 }
  0x50   : > { %s576_s14 = sshll.u32 %s574_s20, 4  ;;  %s577_s14 = int_to_ptr.hbm [resolvable:$true] %s576_s14 }
  0x51   : > { %s3937_s30 = sshra.s32 %s577_s14, 4  ;;  %s3938_s30 = int_to_ptr.hbm [resolvable:$true] %s3937_s30 }
  0x52   : > { %s3939_s23 = scalar_lea.hbm %s3938_s30, 3  ;;  %p3945_p6 = scmp.lt.s32.totalorder %s3938_s30, %s5268_s5 }
  0x53   : > { %p3940_p1 = scmp.ne.s32.totalorder %s3938_s30, %s3939_s23  ;;  %p3946_p7 = scmp.lt.s32.totalorder %s3944_s11, %s3939_s23 }
  0x55   : > { %p3942_p3 = pnand %p3940_p1, %p4500_p2  ;;  %p3947_p11 = por %p3946_p7, %p3945_p6 }
  0x57   : > { %p3943_p4 = pneg %p3942_p3 }
  0x59   : > { %p3948_p13 = pnand %p3947_p11, %p3943_p4 }
  0x5b   : > { %3951 = shalt.err (!%p3948_p13)
}
  0x5c   : > { %3687 = dma.hbm_to_vmem [thread:$0]  (!%p4485_p0), %s577_s14, 48, %s579_s21, %s5294_s29  }
  0x5d   : > { %s615_s2 = sshll.u32 %s613_s22, 4  ;;  %s610_s17 = scalar_lea.vmem [#allocation14], %s4490_s27  ;;  %s616_s2 = int_to_ptr.hbm [resolvable:$true] %s615_s2 }
  0x5e   : > { %s617_s20 = sshll.u32 %s610_s17, 4  ;;  %s5295_s26 = scalar_lea.sflag [#allocation15], %s4476_s1  ;;  %s618_s20 = int_to_ptr.vmem [resolvable:$true] %s617_s20 }
  0x5f   : > { %s3967_s18 = sshra.s32 %s616_s2, 4  ;;  %s3974_s15 = scalar_lea.hbm %s5270_s7, 2  ;;  %s3968_s18 = int_to_ptr.hbm [resolvable:$true] %s3967_s18 }
  0x60   : > { %s3969_s30 = scalar_lea.hbm %s3968_s18, 1  ;;  %p3975_p6 = scmp.lt.s32.totalorder %s3968_s18, %s5270_s7 }
  0x61   : > { %p3970_p1 = scmp.ne.s32.totalorder %s3968_s18, %s3969_s30  ;;  %p3976_p7 = scmp.lt.s32.totalorder %s3974_s15, %s3969_s30 }
  0x63   : > { %p3972_p3 = pnand %p3970_p1, %p4500_p2  ;;  %p3977_p11 = por %p3976_p7, %p3975_p6 }
  0x65   : > { %p3973_p4 = pneg %p3972_p3 }
  0x67   : > { %p3978_p13 = pnand %p3977_p11, %p3973_p4 }
  0x69   : > { %3981 = shalt.err (!%p3978_p13)
}
  0x6a   : > { %3693 = dma.hbm_to_vmem [thread:$0]  (!%p4485_p0), %s616_s2, 16, %s618_s20, %s5295_s26  }
  0x6b   : > { %s647_s14 = scalar_lea.hbm %s5272_s9, %s4299_s0  ;;  %s644_s16 = scalar_lea.vmem [#allocation17], %s4490_s27 }
  0x6c   : > { %s651_s17 = sshll.u32 %s644_s16, 4  ;;  %s649_s18 = sshll.u32 %s647_s14, 4  ;;  %s652_s17 = int_to_ptr.vmem [resolvable:$true] %s651_s17  ;;  %s650_s18 = int_to_ptr.hbm [resolvable:$true] %s649_s18 }
  0x6d   : > { %s5324_s13 = sld [smem:[#allocation41_spill]]  ;;  %s5297_s11 = scalar_lea.sflag [#allocation18], %s4476_s1 }
  0x6e   : > { %s3997_s24 = sshra.s32 %s650_s18, 4  ;;  %s4004_s22 = scalar_lea.hbm %s5272_s9, 2  ;;  %s3998_s24 = int_to_ptr.hbm [resolvable:$true] %s3997_s24 }
  0x6f   : > { %s3999_s29 = scalar_lea.hbm %s3998_s24, 1  ;;  %p4005_p6 = scmp.lt.s32.totalorder %s3998_s24, %s5272_s9 }
  0x70   : > { %p4000_p1 = scmp.ne.s32.totalorder %s3998_s24, %s3999_s29  ;;  %p4006_p7 = scmp.lt.s32.totalorder %s4004_s22, %s3999_s29 }
  0x72   : > { %p4002_p3 = pnand %p4000_p1, %p4500_p2  ;;  %p4007_p11 = por %p4006_p7, %p4005_p6 }
  0x73   : > { %s485_s15 = sshll.u32 %s5324_s13, 4  ;;  %s486_s15 = int_to_ptr.hbm [resolvable:$true] %s485_s15 }
  0x74   : > { %p4003_p4 = pneg %p4002_p3 }
  0x76   : > { %p4008_p13 = pnand %p4007_p11, %p4003_p4 }
  0x78   : > { %4011 = shalt.err (!%p4008_p13)
}
  0x79   : > { %3699 = dma.hbm_to_vmem [thread:$0]  (!%p4485_p0), %s650_s18, 16, %s652_s17, %s5297_s11  }
  0x7a   : > { %s4305_s16 = smov [#allocation5]   ;;  %s4306_s23 = smov 128  }
  0x7b   : > { %s487_s30 = sshll.u32 %s4305_s16, 4  ;;  %s4307_s13 = smov 8   ;;  %s488_s30 = int_to_ptr.vmem [resolvable:$true] %s487_s30 }
  0x7c   : > { %3674 = dma.hbm_to_vmem [thread:$0]  (!%p4470_p12), %s486_s15, 256, %s488_s30, [#allocation6], %s4306_s23, %s4306_s23, %s4307_s13  }
  0x7d   : > { %s3635_s29 = smul.u32 192, %s4490_s27  ;;  %s3064_s2 = sshll.u32 %s4490_s27, 6 }
  0x7e   : > { %s3636_s24 = smul.u32 192, %s4299_s0  ;;  %s4064_s16 = scalar_lea.hbm %s5267_s4, 384 }
  0x7f   : > { %s548_s14 = scalar_lea.vmem [#allocation10], %s3635_s29 }
  0x80   : > { %s553_s21 = scalar_lea.hbm %s5267_s4, %s3636_s24  ;;  %s556_s26 = sshll.u32 %s548_s14, 4  ;;  %s557_s26 = int_to_ptr.vmem [resolvable:$true] %s556_s26 }
  0x81   : > { %s554_s3 = sshll.u32 %s553_s21, 4  ;;  %s555_s3 = int_to_ptr.hbm [resolvable:$true] %s554_s3 }
  0x82   : > { %s4057_s17 = sshra.s32 %s555_s3, 4  ;;  %s4058_s17 = int_to_ptr.hbm [resolvable:$true] %s4057_s17 }
  0x83   : > { %s4059_s18 = scalar_lea.hbm %s4058_s17, 192  ;;  %p4065_p12 = scmp.lt.s32.totalorder %s4058_s17, %s5267_s4 }
  0x84   : > { %p4060_p1 = scmp.ne.s32.totalorder %s4058_s17, %s4059_s18  ;;  %p4066_p6 = scmp.lt.s32.totalorder %s4064_s16, %s4059_s18 }
  0x86   : > { %p4062_p3 = pnand %p4060_p1, %p4500_p2  ;;  %p4067_p7 = por %p4066_p6, %p4065_p12 }
  0x88   : > { %p4063_p4 = pneg %p4062_p3 }
  0x8a   : > { %p4068_p11 = pnand %p4067_p7, %p4063_p4 }
  0x8c   : > { %4071 = shalt.err (!%p4068_p11)
}
  0x8d   : > { %s4308_s13 = smov 192   ;;  %s4309_s29 = smov 12  }
  0x8e   : > { %s5325_s24 = scalar_lea.sflag [#allocation9], %s4476_s1  ;;  %s3528_s20 = sshll.u32 %s4299_s0, 6 }
  0x8f   : > { %3684 = dma.hbm_to_vmem [thread:$0]  (!%p4485_p0), %s555_s3, 3072, %s557_s26, %s5325_s24, %s4308_s13, %s4308_s13, %s4309_s29  }
  0x90   : > { %s589_s22 = scalar_lea.vmem [#allocation13], %s3064_s2  ;;  %s594_s17 = scalar_lea.hbm %s5269_s6, %s3528_s20 }
  0x91   : > { %s597_s21 = sshll.u32 %s589_s22, 4  ;;  %s595_s18 = sshll.u32 %s594_s17, 4  ;;  %s598_s21 = int_to_ptr.vmem [resolvable:$true] %s597_s21  ;;  %s596_s18 = int_to_ptr.hbm [resolvable:$true] %s595_s18 }
  0x92   : > { %s630_s30 = scalar_lea.hbm %s5271_s8, %s4299_s0  ;;  %s4087_s23 = sshra.s32 %s596_s18, 4  ;;  %s4088_s23 = int_to_ptr.hbm [resolvable:$true] %s4087_s23 }
  0x93   : > { %s4089_s11 = scalar_lea.hbm %s4088_s23, 64  ;;  %s4094_s2 = scalar_lea.hbm %s5269_s6, 128 }
  0x94   : > { %p4090_p13 = scmp.ne.s32.totalorder %s4088_s23, %s4089_s11  ;;  %p4095_p4 = scmp.lt.s32.totalorder %s4088_s23, %s5269_s6 }
  0x95   : > { %p4096_p12 = scmp.lt.s32.totalorder %s4094_s2, %s4089_s11 }
  0x96   : > { %p4092_p1 = pnand %p4090_p13, %p4500_p2 }
  0x97   : > { %p4097_p6 = por %p4096_p12, %p4095_p4 }
  0x98   : > { %p4093_p3 = pneg %p4092_p1 }
  0x9a   : > { %p4098_p7 = pnand %p4097_p6, %p4093_p3 }
  0x9c   : > { %4101 = shalt.err (!%p4098_p7)
}
  0x9d   : > { %s5326_s24 = smov 4   ;;  %s5327_s20 = smov 64  }
  0x9e   : > { %s5328_s22 = scalar_lea.sflag [#allocation12], %s4476_s1  ;;  %s632_s14 = sshll.u32 %s630_s30, 4  ;;  %s633_s14 = int_to_ptr.hbm [resolvable:$true] %s632_s14 }
  0x9f   : > { %3690 = dma.hbm_to_vmem [thread:$0]  (!%p4485_p0), %s596_s18, 1024, %s598_s21, %s5328_s22, %s5327_s20, %s5327_s20, %s5326_s24  }
  0xa0   : > { %s627_s19 = scalar_lea.vmem [#allocation16], %s4490_s27  ;;  %s4117_s15 = sshra.s32 %s633_s14, 4  ;;  %s4118_s15 = int_to_ptr.hbm [resolvable:$true] %s4117_s15 }
  0xa1   : > { %s634_s17 = sshll.u32 %s627_s19, 4  ;;  %s4119_s11 = scalar_lea.hbm %s4118_s15, 1  ;;  %s635_s17 = int_to_ptr.vmem [resolvable:$true] %s634_s17 }
  0xa2   : > { %p4120_p11 = scmp.ne.s32.totalorder %s4118_s15, %s4119_s11  ;;  %s4124_s3 = scalar_lea.hbm %s5271_s8, 2 }
  0xa3   : > { %p4125_p3 = scmp.lt.s32.totalorder %s4118_s15, %s5271_s8  ;;  %p4126_p4 = scmp.lt.s32.totalorder %s4124_s3, %s4119_s11 }
  0xa4   : > { %p4122_p13 = pnand %p4120_p11, %p4500_p2 }
  0xa5   : > { %p4127_p12 = por %p4126_p4, %p4125_p3 }
  0xa6   : > { %p4123_p1 = pneg %p4122_p13 }
  0xa8   : > { %p4128_p6 = pnand %p4127_p12, %p4123_p1 }
  0xaa   : > { %4131 = shalt.err (!%p4128_p6)
}
  0xab   : > { %s5329_s21 = scalar_lea.sflag [#allocation15], %s4476_s1  ;;  %s3067_s18 = sshll.u32 %s4490_s27, 8 }
  0xac   : > { %3696 = dma.hbm_to_vmem [thread:$0]  (!%p4485_p0), %s633_s14, 16, %s635_s17, %s5329_s21  }
  0xad   : > { %s3529_s30 = sshll.u32 %s4299_s0, 8  ;;  %s662_s15 = scalar_lea.vmem [#allocation19], %s3067_s18 }
  0xae   : > { %s667_s22 = scalar_lea.hbm %s5273_s10, %s3529_s30  ;;  %s670_s11 = sshll.u32 %s662_s15, 4  ;;  %s671_s11 = int_to_ptr.vmem [resolvable:$true] %s670_s11 }
  0xaf   : > { %s668_s19 = sshll.u32 %s667_s22, 4  ;;  %s4154_s0 = scalar_lea.hbm %s5273_s10, 512  ;;  %s669_s19 = int_to_ptr.hbm [resolvable:$true] %s668_s19 }
  0xb0   : > { %s4147_s16 = sshra.s32 %s669_s19, 4  ;;  %s4148_s16 = int_to_ptr.hbm [resolvable:$true] %s4147_s16 }
  0xb1   : > { %s4149_s23 = scalar_lea.hbm %s4148_s16, 256  ;;  %p4155_p1 = scmp.lt.s32.totalorder %s4148_s16, %s5273_s10 }
  0xb2   : > { %p4150_p7 = scmp.ne.s32.totalorder %s4148_s16, %s4149_s23  ;;  %p4156_p3 = scmp.lt.s32.totalorder %s4154_s0, %s4149_s23 }
  0xb4   : > { %p4152_p11 = pnand %p4150_p7, %p4500_p2  ;;  %p4157_p4 = por %p4156_p3, %p4155_p1 }
  0xb6   : > { %p4153_p13 = pneg %p4152_p11 }
  0xb8   : > { %p4158_p12 = pnand %p4157_p4, %p4153_p13 }
  0xba   : > { %4161 = shalt.err (!%p4158_p12)
}
  0xbb   : > { %s4310_s26 = smov 256   ;;  %s4311_s2 = smov 16  }
  0xbc   : > { %s5330_s21 = scalar_lea.sflag [#allocation18], %s4476_s1  ;;  %s696_s22 = scalar_lea.hbm %s5275_s12, %s3529_s30 }
  0xbd   : > { %3702 = dma.hbm_to_vmem [thread:$0]  (!%p4485_p0), %s669_s19, 4096, %s671_s11, %s5330_s21, %s4310_s26, %s4310_s26, %s4311_s2  }
  0xbe   : > { %s691_s15 = scalar_lea.vmem [#allocation20], %s3067_s18  ;;  %s697_s16 = sshll.u32 %s696_s22, 4  ;;  %s698_s16 = int_to_ptr.hbm [resolvable:$true] %s697_s16 }
  0xbf   : > { %s699_s3 = sshll.u32 %s691_s15, 4  ;;  %s688_s23 = scalar_lea.sflag [#allocation21], %s4476_s1  ;;  %s700_s3 = int_to_ptr.vmem [resolvable:$true] %s699_s3 }
  0xc0   : > { %s4177_s14 = sshra.s32 %s698_s16, 4  ;;  %s4184_s19 = scalar_lea.hbm %s5275_s12, 512  ;;  %s4178_s14 = int_to_ptr.hbm [resolvable:$true] %s4177_s14 }
  0xc1   : > { %s4179_s0 = scalar_lea.hbm %s4178_s14, 256  ;;  %p4185_p13 = scmp.lt.s32.totalorder %s4178_s14, %s5275_s12 }
  0xc2   : > { %p4180_p6 = scmp.ne.s32.totalorder %s4178_s14, %s4179_s0  ;;  %p4186_p1 = scmp.lt.s32.totalorder %s4184_s19, %s4179_s0 }
  0xc4   : > { %p4182_p7 = pnand %p4180_p6, %p4500_p2  ;;  %p4187_p3 = por %p4186_p1, %p4185_p13 }
  0xc6   : > { %p4183_p11 = pneg %p4182_p7 }
  0xc8   : > { %p4188_p4 = pnand %p4187_p3, %p4183_p11 }
  0xca   : > { %4191 = shalt.err (!%p4188_p4)
}
  0xcb   : > { %3705 = dma.hbm_to_vmem [thread:$0]  (!%p4485_p0), %s698_s16, 4096, %s700_s3, %s688_s23, %s5327_s20, %s5327_s20, %s5326_s24  }
  0xcc   : > { %717 = sbr.rel (%p4459_p10) target bundleno = 3826 (0xef2), region = 84  ;;  %s5332_s28 = sld [smem:[#allocation35_spill]] (!%p4459_p10) }
  0xd1   : > { %4254 = dma.done.wait (%p94_p5), [#allocation6], 256  }
  0xd2   : > { %4256 = vsyncadd (%p94_p5), [#allocation6], 4294967040  ;;  %s5333_s18 = sld [smem:[#allocation33_spill]]  ;;  %s4670_s2 = sand.u32 1, %s5332_s28  }
  0xd3   : > { %s725_s21 = scalar_lea.sflag [#allocation9], %s4670_s2 }
  0xd8   : > { %s4673_s25 = sand.u32 1, %s5333_s18  }
  0xd9   : > { %s727_s24 = scalar_lea.vmem [#allocation8], %s4673_s25 }
  0xda   : > { %4258 = dma.done.wait (%p4454_p8), %s725_s21, 3088  }
  0xdb   : > { %4260 = vsyncadd (%p4454_p8), %s725_s21, 4294964208  ;;  %s3639_s20 = smul.u32 192, %s4673_s25  ;;  %s744_s22 = scalar_lea.sflag [#allocation12], %s4670_s2 }
  0xdc   : > { %s3640_s13 = smul.u32 3, %s4673_s25 }
  0xdd   : > { %s4683_s29 = scalar_lea.vmem [#allocation10], %s3639_s20 }
  0xde   : > { %s4686_s15 = scalar_lea.vmem [#allocation11], %s3640_s13 }
  0xdf   : > { %4262 = dma.done.wait (%p4454_p8), %s744_s22, 1072  }
  0xe0   : > { %4264 = vsyncadd (%p4454_p8), %s744_s22, 4294966224  ;;  %s3075_s3 = sshll.u32 %s4673_s25, 6  ;;  %s764_s23 = scalar_lea.sflag [#allocation15], %s4670_s2 }
  0xe1   : > { %s4693_s16 = scalar_lea.vmem [#allocation13], %s3075_s3  ;;  %s766_s14 = scalar_lea.vmem [#allocation14], %s4673_s25 }
  0xe2   : > { %4266 = dma.done.wait (%p4454_p8), %s764_s23, 32  }
  0xe3   : > { %4268 = vsyncadd (%p4454_p8), %s764_s23, 4294967264  ;;  %s782_s27 = scalar_lea.sflag [#allocation18], %s4670_s2 }
  0xe4   : > { %4270 = dma.done.wait (%p4454_p8), %s782_s27, 4112  }
  0xe5   : > { %4272 = vsyncadd (%p4454_p8), %s782_s27, 4294963184  ;;  %s3076_s19 = sshll.u32 %s4673_s25, 8  ;;  %s801_s26 = scalar_lea.sflag [#allocation21], %s4670_s2 }
  0xe6   : > { %s4709_s11 = scalar_lea.vmem [#allocation19], %s3076_s19  ;;  %s4712_s1 = scalar_lea.vmem [#allocation20], %s3076_s19 }
  0xe7   : > { %4274 = dma.done.wait (%p4454_p8), %s801_s26, 4096  }
  0xe8   : > { %4276 = vsyncadd (%p4454_p8), %s801_s26, 4294963200 }
  0xe9   : > { %4278 = dma.done.wait (%p94_p5), [#allocation21], 1024  }
  0xea   : > { %4280 = vsyncadd (%p94_p5), [#allocation21], 4294966272  ;;  %p900_p10 = scmp.lt.s32.totalorder %s5332_s28, 1  ;;  %s5335_s20 = sld [smem:[#allocation43_spill]] }
  0xeb   : > { %s5336_s23 = sld [smem:[#allocation44_spill]] }
  0xec   : > { %s4724_s18 = scalar_select %p900_p10, %s5332_s28, 1 }
  0xed   : > { %s5337_s17 = sld [smem:[#allocation45_spill]] }
  0xee   : > { %s3079_s30 = sshll.u32 %s4724_s18, 2 }
  0xef   : > { %913 = sbr.rel (%p3060_p9) target bundleno = 247 (0xf7), region = 132 }
  0xf0   : > { %s902_s13 = scalar_lea.vmem %s5335_s20, %s4724_s18 }
  0xf1   : > { %s4734_s27 = scalar_lea.vmem %s5336_s23, %s3079_s30 }
  0xf3   : > { %s909_s0 = scalar_lea.vmem %s5337_s17, %s4724_s18 }
  0xf4   : > { %v914_v0 = vld [vmem:[#allocation5] sm:$0xff]  ;;  %v915_v1 = vld [vmem:[#allocation5 + $0x8] sm:$0xff] }
  0xf5   : > { %916 = vst [vmem:[#allocation2] sm:$0xff] %v914_v0 }
  0xf6   : > { %917 = vst [vmem:[#allocation2 + $0x8] sm:$0xff] %v915_v1 }
  0xf7 PF: > { %v4312_v4 = vmov 128.0   ;;  %v3167_v19 = vld [vmem:[%s4683_s29 + $0xa8] sm:$0xf]  ;;  %v3553_v20 = vld [vmem:[%s4683_s29 + $0xb0] sm:$0xf0]  ;;  %vm1197_vm7 = vcmask 261120  }
  0xf8   : > { %3783 = vrcp.f32 %v4312_v4  ;;  %v3552_v21 = vld [vmem:[%s4683_s29 + $0xac] sm:$0xf]  ;;  %v3168_v22 = vor.u32 %v3553_v20, %v3167_v19  ;;  %v3169_v23 = vld [vmem:[%s4683_s29 + $0xb4] sm:$0xf0]  ;;  %v3175_v24 = vld [vmem:[%s4683_s29 + $0xb0] sm:$0xf] }
  0xf9   : > { %v3554_v25 = vld [vmem:[%s4683_s29 + $0xb8] sm:$0xf0]  ;;  %v3172_v26 = vor.u32 %v3552_v21, %v3169_v23  ;;  %v3155_v28 = vld [vmem:[%s4683_s29 + $0x90] sm:$0xf]  ;;  %v3549_v30 = vld [vmem:[%s4683_s29 + $0x94] sm:$0xf] }
  0xfa   : > { %v3176_v27 = vor.u32 %v3554_v25, %v3175_v24  ;;  %1154 = vmatpush.bf16.msra.mxu0 %v3168_v22  ;;  %v3550_v29 = vld [vmem:[%s4683_s29 + $0x98] sm:$0xf0]  ;;  %v3157_v32 = vld [vmem:[%s4683_s29 + $0x9c] sm:$0xf0]  ;;  %v3163_v33 = vld [vmem:[%s4683_s29 + $0x98] sm:$0xf] }
  0xfb   : > { %1168 = vmatpush.bf16.msra.mxu1 %v3172_v26  ;;  %v3156_v31 = vor.u32 %v3550_v29, %v3155_v28  ;;  %v3551_v34 = vld [vmem:[%s4683_s29 + $0xa0] sm:$0xf0]  ;;  %v3160_v35 = vor.u32 %v3549_v30, %v3157_v32  ;;  %v3143_v37 = vld [vmem:[%s4683_s29 + $0x78] sm:$0xf]  ;;  %v3546_v39 = vld [vmem:[%s4683_s29 + $0x7c] sm:$0xf] }
  0xfc   : > { %v4742_v2 = vld [vmem:[#allocation2] sm:$0xff]  ;;  %1182 = vmatpush.bf16.msra.mxu2 %v3176_v27  ;;  %v3164_v36 = vor.u32 %v3551_v34, %v3163_v33  ;;  %v3145_v41 = vld [vmem:[%s4683_s29 + $0x84] sm:$0xf0]  ;;  %v3548_v43 = vld [vmem:[%s4683_s29 + $0x88] sm:$0xf0]  ;;  %vm1224_vm9 = vcmask 64512  }
  0xfd   : > { %928 = vadd.xlane.f32.xlu0 %v4742_v2  ;;  %v4745_v3 = vld [vmem:[#allocation2 + $0x8] sm:$0xff]  ;;  %v3151_v42 = vld [vmem:[%s4683_s29 + $0x80] sm:$0xf]  ;;  %v3148_v44 = vor.u32 %v3546_v39, %v3145_v41  ;;  %v3133_v50 = vld [vmem:[%s4683_s29 + $0x6c] sm:$0xf0]  ;;  %s4316_s2 = smov 32  }
  0xfe   : > { %v3784_v5 = vpop.eup %3783  ;;  %1155 = vmatpush.bf16.msra.mxu0 %v3156_v31  ;;  %v3547_v38 = vld [vmem:[%s4683_s29 + $0x80] sm:$0xf0]  ;;  %v3152_v45 = vor.u32 %v3548_v43, %v3151_v42  ;;  %v3131_v46 = vld [vmem:[%s4683_s29 + $0x60] sm:$0xf]  ;;  %v3544_v47 = vld [vmem:[%s4683_s29 + $0x68] sm:$0xf0] }
  0xff   : > { %v933_v6 = vmul.f32 128.0, %v3784_v5  ;;  %vm937_vm0 = vweird.f32 %v3784_v5  ;;  %1169 = vmatpush.bf16.msra.mxu1 %v3160_v35  ;;  %v3144_v40 = vor.u32 %v3547_v38, %v3143_v37  ;;  %v3543_v48 = vld [vmem:[%s4683_s29 + $0x64] sm:$0xf]  ;;  %v3132_v49 = vor.u32 %v3544_v47, %v3131_v46  ;;  %v3139_v51 = vld [vmem:[%s4683_s29 + $0x68] sm:$0xf] }
 0x100   : > { %1183 = vmatpush.bf16.msra.mxu2 %v3164_v36  ;;  %v3545_v52 = vld [vmem:[%s4683_s29 + $0x70] sm:$0xf0]  ;;  %v3136_v53 = vor.u32 %v3543_v48, %v3133_v50  ;;  %v3119_v55 = vld [vmem:[%s4683_s29 + $0x48] sm:$0xf]  ;;  %v3540_v57 = vld [vmem:[%s4683_s29 + $0x4c] sm:$0xf] }
 0x101   : > { %v934_v7 = vsub.f32 1.0, %v933_v6  ;;  %v3140_v54 = vor.u32 %v3545_v52, %v3139_v51  ;;  %v3541_v56 = vld [vmem:[%s4683_s29 + $0x50] sm:$0xf0]  ;;  %v3121_v59 = vld [vmem:[%s4683_s29 + $0x54] sm:$0xf0]  ;;  %vm1468_vm10 = vcmask 523264  }
 0x102   : > { %1156 = vmatpush.bf16.msra.mxu0 %v3144_v40  ;;  %v3120_v58 = vor.u32 %v3541_v56, %v3119_v55  ;;  %v3127_v60 = vld [vmem:[%s4683_s29 + $0x50] sm:$0xf]  ;;  %v3542_v61 = vld [vmem:[%s4683_s29 + $0x58] sm:$0xf0]  ;;  %v3124_v62 = vor.u32 %v3540_v57, %v3121_v59  ;;  %v3537_v4 = vld [vmem:[%s4683_s29 + $0x34] sm:$0xf] }
 0x103   : > { %v935_v8 = vmul.f32 %v3784_v5, %v934_v7  ;;  %1170 = vmatpush.bf16.msra.mxu1 %v3148_v44  ;;  %v3128_v63 = vor.u32 %v3542_v61, %v3127_v60  ;;  %v3107_v0 = vld [vmem:[%s4683_s29 + $0x30] sm:$0xf]  ;;  %v3538_v1 = vld [vmem:[%s4683_s29 + $0x38] sm:$0xf0]  ;;  %v3109_v6 = vld [vmem:[%s4683_s29 + $0x3c] sm:$0xf0] }
 0x104   : > { %1184 = vmatpush.bf16.msra.mxu2 %v3152_v45  ;;  %v3115_v7 = vld [vmem:[%s4683_s29 + $0x38] sm:$0xf]  ;;  %v3103_v19 = vld [vmem:[%s4683_s29 + $0x20] sm:$0xf]  ;;  %v3536_v20 = vld [vmem:[%s4683_s29 + $0x28] sm:$0xf0] }
 0x105   : > { %930 = vadd.xlane.f32.xlu0 %v4745_v3  ;;  %v936_v9 = vadd.f32 %v3784_v5, %v935_v8  ;;  %v3539_v8 = vld [vmem:[%s4683_s29 + $0x40] sm:$0xf0]  ;;  %v3104_v22 = vor.u32 %v3536_v20, %v3103_v19  ;;  %v3083_v23 = vld [vmem:[%s4683_s29] sm:$0xf]  ;;  %v3532_v24 = vld [vmem:[%s4683_s29 + $0x8] sm:$0xf0] }
 0x106   : > { %1157 = vmatpush.bf16.msra.mxu0 %v3132_v49  ;;  %v3531_v25 = vld [vmem:[%s4683_s29 + $0x4] sm:$0xf]  ;;  %v3084_v27 = vor.u32 %v3532_v24, %v3083_v23  ;;  %v3085_v28 = vld [vmem:[%s4683_s29 + $0xc] sm:$0xf0]  ;;  %v3091_v29 = vld [vmem:[%s4683_s29 + $0x8] sm:$0xf] }
 0x107   : > { %v4748_v10 = vsel %vm937_vm0, %v3784_v5, %v936_v9  ;;  %1171 = vmatpush.bf16.msra.mxu1 %v3136_v53  ;;  %v3108_v5 = vor.u32 %v3538_v1, %v3107_v0  ;;  %v3112_v9 = vor.u32 %v3537_v4, %v3109_v6  ;;  %v3533_v30 = vld [vmem:[%s4683_s29 + $0x10] sm:$0xf0]  ;;  %v3088_v32 = vor.u32 %v3531_v25, %v3085_v28  ;;  %v3777_v51 = vld [vmem:[%s727_s24] ss:$0 sm:$0xff]  ;;  %s4313_s24 = smov 96  }
 0x108   : > { %1185 = vmatpush.bf16.msra.mxu2 %v3140_v54  ;;  %v3092_v33 = vor.u32 %v3533_v30, %v3091_v29  ;;  %v3778_v56 = vld [vmem:[%s902_s13] ss:$0 sm:$0xff]  ;;  %vm1470_vm11 = vcmask 785408  }
 0x10a   : > { %1158 = vmatpush.bf16.msra.mxu0 %v3120_v58 }
 0x10b   : > { %1172 = vmatpush.bf16.msra.mxu1 %v3124_v62 }
 0x10c   : > { %1186 = vmatpush.bf16.msra.mxu2 %v3128_v63 }
 0x10e   : > { %1159 = vmatpush.bf16.msra.mxu0 %v3108_v5 }
 0x10f   : > { %1173 = vmatpush.bf16.msra.mxu1 %v3112_v9  ;;  %v920_v9 = vlaneseq }
 0x170   : > { %v929_v11 = vpop.xlane.xlu0 %928 }
 0x171   : > { %v939_v12 = vmul.f32 %v4748_v10, %v929_v11  ;;  %v3116_v11 = vor.u32 %v3539_v8, %v3115_v7 }
 0x173   : > { %v4752_v13 = vsub.f32 %v4742_v2, %v939_v12  ;;  %1187 = vmatpush.bf16.msra.mxu2 %v3116_v11  ;;  %v3095_v12 = vld [vmem:[%s4683_s29 + $0x18] sm:$0xf]  ;;  %v921_v11 = vshrl.u32 %v920_v9, 7 }
 0x175   : > { %v943_v14 = vmul.f32 %v4752_v13, %v4752_v13 }
 0x177   : > { %945 = vadd.xlane.f32.xlu1 %v943_v14  ;;  %v3535_v14 = vld [vmem:[%s4683_s29 + $0x20] sm:$0xf0]  ;;  %1188 = vmatpush.bf16.msra.mxu2 %v3104_v22 }
 0x178   : > { %v931_v15 = vpop.xlane.xlu0 %930 }
 0x179   : > { %v940_v16 = vmul.f32 %v4748_v10, %v931_v15  ;;  %v3534_v15 = vld [vmem:[%s4683_s29 + $0x1c] sm:$0xf] }
 0x17b   : > { %v4758_v17 = vsub.f32 %v4745_v3, %v940_v16  ;;  %v3096_v16 = vor.u32 %v3535_v14, %v3095_v12  ;;  %1189 = vmatpush.bf16.msra.mxu2 %v3092_v33  ;;  %v923_v12 = vand.u32 127, %v920_v9  ;;  %v4315_v14 = vmov -1e+09  }
 0x17d   : > { %v944_v18 = vmul.f32 %v4758_v17, %v4758_v17  ;;  %1160 = vmatpush.bf16.msra.mxu0 %v3096_v16  ;;  %vm924_vm8 = vcmp.le.s32.totalorder %v923_v12, %v921_v11 }
 0x17f   : > { %947 = vadd.xlane.f32.xlu1 %v944_v18  ;;  %v3097_v18 = vld [vmem:[%s4683_s29 + $0x24] sm:$0xf0] }
 0x180   : > { %v3100_v21 = vor.u32 %v3534_v15, %v3097_v18  ;;  %v4843_v15 = vsel %vm924_vm8, 0.0, %v4315_v14 }
 0x181   : > { %1161 = vmatpush.bf16.msra.mxu0 %v3084_v27 }
 0x182   : > { %1174 = vmatpush.bf16.msra.mxu1 %v3100_v21 }
 0x186   : > { %1175 = vmatpush.bf16.msra.mxu1 %v3088_v32 }
 0x1ea   : > { %v946_v26 = vpop.xlane.xlu1 %945 }
 0x1eb   : > { %v949_v31 = vmul.f32 %v946_v26, %v4748_v10 }
 0x1ed   : > { %v951_v34 = vadd.f32 1e-05, %v949_v31 }
 0x1ef   : > { %3785 = vrsqrt.f32 %v951_v34  ;;  %vm959_vm2 = vweird.f32 %v951_v34 }
 0x1f2   : > { %v948_v35 = vpop.xlane.xlu1 %947 }
 0x1f3   : > { %v950_v36 = vmul.f32 %v948_v35, %v4748_v10 }
 0x1f5   : > { %v3786_v37 = vpop.eup %3785  ;;  %v952_v38 = vadd.f32 1e-05, %v950_v36 }
 0x1f6   : > { %v954_v39 = vmul.f32 %v3786_v37, %v951_v34  ;;  %vm960_vm1 = vweird.f32 %v3786_v37 }
 0x1f7   : > { %3787 = vrsqrt.f32 %v952_v38  ;;  %vm961_vm3 = vmor %vm959_vm2, %vm960_vm1  ;;  %vm969_vm5 = vweird.f32 %v952_v38 }
 0x1f8   : > { %v955_v40 = vmul.f32 %v3786_v37, %v954_v39 }
 0x1fa   : > { %v956_v41 = vmul.f32 0.5, %v955_v40 }
 0x1fc   : > { %v957_v42 = vsub.f32 1.5, %v956_v41 }
 0x1fd   : > { %v3788_v43 = vpop.eup %3787 }
 0x1fe   : > { %v958_v44 = vmul.f32 %v3786_v37, %v957_v42  ;;  %v964_v45 = vmul.f32 %v3788_v43, %v952_v38  ;;  %vm970_vm4 = vweird.f32 %v3788_v43 }
 0x1ff   : > { %vm971_vm6 = vmor %vm969_vm5, %vm970_vm4 }
 0x200   : > { %v965_v46 = vmul.f32 %v3788_v43, %v964_v45  ;;  %v962_v47 = vsel %vm961_vm3, %v3786_v37, %v958_v44 }
 0x201   : > { %v973_v50 = vmul.f32 %v962_v47, %v4752_v13  ;;  %v4822_v13 = vld [vmem:[%s4686_s15] sm:$0x7]  ;;  %s4314_s15 = smov 64  }
 0x202   : > { %v966_v48 = vmul.f32 0.5, %v965_v46  ;;  %v1020_v61 = vperm.slane %v4822_v13, 0  ;;  %v1021_v62 = vperm.slane %v4822_v13, 1  ;;  %v1022_v5 = vperm.slane %v4822_v13, 2 }
 0x203   : > { %v978_v55 = vmul.f32 %v3777_v51, %v973_v50 }
 0x204   : > { %v967_v49 = vsub.f32 1.5, %v966_v48 }
 0x205   : > { %v983_v58 = vadd.f32 %v3778_v56, %v978_v55 }
 0x206   : > { %v968_v52 = vmul.f32 %v3788_v43, %v967_v49 }
 0x208   : > { %v972_v53 = vsel %vm971_vm6, %v3788_v43, %v968_v52 }
 0x209   : > { %v974_v54 = vmul.f32 %v972_v53, %v4758_v17 }
 0x20b   : > { %v979_v57 = vmul.f32 %v3777_v51, %v974_v54 }
 0x20d   : > { %v984_v59 = vadd.f32 %v3778_v56, %v979_v57 }
 0x20f   : > { %v985_v60 = vpack.c.bf16 %v984_v59, %v983_v58 }
 0x211   : > { %1162 = vmatmul.bf16.vlgmr.msra.gmra.mxu0 %v985_v60  ;;  %1176 = vmatmul.bf16.vlgmr.msra.gmra.mxu1 %v985_v60 }
 0x212   : > { %1190 = vmatmul.bf16.vlgmr.msra.gmra.mxu2 %v985_v60 }
 0x28e   : > { %v1163_v17 = vpop.f32.mrf.mxu0  ;;  %v1177_v63 = vpop.f32.mrf.mxu1 }
 0x28f   : > { %v1164_v0 = vadd.f32 %v1163_v17, %v1020_v61  ;;  %v1178_v1 = vadd.f32 %v1177_v63, %v1021_v62 }
 0x291   : > { %v1196_v4 = vmul.f32 0.17677669, %v1164_v0  ;;  %1261 = vrot.lane.b32.xlu0 %v1178_v1, %s4313_s24  ;;  %3177 = vmatpush.xpose.msk.msra.mxu3 %vm1197_vm7, %v1178_v1 }
 0x293   : > { %1259 = vrot.lane.b32.xlu1 %v1196_v4, %s4313_s24 }
 0x294   : > { %3178 = vmatmul.msk.f32.vlgmr.msra.gmra.mxu3 %vm1197_vm7, %v1196_v4 }
 0x295   : > { %v1191_v6 = vpop.f32.mrf.mxu2 }
 0x296   : > { %v4837_v7 = vadd.f32 %v1191_v6, %v1022_v5  ;;  %v1179_v38 = vpop.f32.mrf.mxu1  ;;  %v1165_v40 = vpop.f32.mrf.mxu0 }
 0x297   : > { %v1180_v39 = vadd.f32 %v1179_v38, %v1021_v62  ;;  %v1166_v41 = vadd.f32 %v1165_v40, %v1020_v61 }
 0x298   : > { %1254 = vmatpush.msrb.mxu3 %v4837_v7 }
 0x299   : > { %1327 = vrot.lane.b32.xlu0 %v1178_v1, %s4314_s15  ;;  %v1472_v42 = vmul.f32 0.17677669, %v1166_v41 }
 0x29b   : > { %1325 = vrot.lane.b32.xlu1 %v1196_v4, %s4314_s15 }
 0x303   : > { %v1262_v8 = vpop.permute.xlu0 %1261 }
 0x304   : > { %3180 = vmatpush.xpose.msk.msra.mxu3 %vm1197_vm7, %v1262_v8  ;;  %v1193_v8 = vpop.f32.mrf.mxu2 }
 0x305   : > { %v1260_v28 = vpop.permute.xlu1 %1259  ;;  %v4890_v12 = vadd.f32 %v1193_v8, %v1022_v5 }
 0x30b   : > { %v1328_v47 = vpop.permute.xlu0 %1327 }
 0x30d   : > { %v1326_v49 = vpop.permute.xlu1 %1325 }
 0x317   : > { %v1221_v16 = vpop.f32.mrf.mxu3 }
 0x318   : > { %v1222_v18 = vadd.f32 %v1221_v16, %v4843_v15 }
 0x31a   : > { %v1225_v19 = vsel %vm1224_vm9, %v1222_v18, -inf }
 0x31b   : > { %1226 = vmax.xlane.f32.xlu2 %v1225_v19 }
 0x38e   : > { %v1227_v20 = vpop.xlane.xlu2 %1226 }
 0x38f   : > { %v1228_v21 = vsub.f32 %v1222_v18, %v1227_v20 }
 0x391   : > { %v1229_v22 = vmul.f32 1.442695, %v1228_v21 }
 0x393   : > { %3789 = vpow2.f32 %v1229_v22 }
 0x399   : > { %v3790_v23 = vpop.eup %3789 }
 0x39a   : > { %v1231_v24 = vsel %vm1224_vm9, %v3790_v23, 0.0 }
 0x39b   : > { %1232 = vadd.xlane.f32.xlu2 %v1231_v24 }
 0x40e   : > { %v1233_v25 = vpop.xlane.xlu2 %1232 }
 0x40f   : > { %3791 = vrcp.f32 %v1233_v25 }
 0x415   : > { %v3792_v26 = vpop.eup %3791 }
 0x416   : > { %v1235_v27 = vmul.f32 %v3792_v26, %v3790_v23 }
 0x418   : > { %3179 = vmatmul.msk.f32.vlgmr.msrb.gmra.mxu3 %vm1224_vm9, %v1235_v27 }
 0x420   : > { %3181 = vmatmul.msk.f32.vlgmr.msra.gmra.mxu3 %vm1197_vm7, %v1260_v28 }
 0x49b   : > { %v4850_v29 = vpop.f32.mrf.mxu3 }
 0x4a3   : > { %v1284_v30 = vpop.f32.mrf.mxu3 }
 0x4a4   : > { %v1285_v31 = vadd.f32 %v1284_v30, %v4843_v15 }
 0x4a6   : > { %v1287_v32 = vsel %vm1224_vm9, %v1285_v31, -inf }
 0x4a7   : > { %1288 = vmax.xlane.f32.xlu2 %v1287_v32 }
 0x51a   : > { %v1289_v33 = vpop.xlane.xlu2 %1288 }
 0x51b   : > { %v1290_v34 = vsub.f32 %v1285_v31, %v1289_v33 }
 0x51d   : > { %v1291_v35 = vmul.f32 1.442695, %v1290_v34 }
 0x51f   : > { %3793 = vpow2.f32 %v1291_v35 }
 0x525   : > { %v3794_v36 = vpop.eup %3793 }
 0x526   : > { %v1293_v37 = vsel %vm1224_vm9, %v3794_v36, 0.0 }
 0x527   : > { %1294 = vadd.xlane.f32.xlu2 %v1293_v37 }
 0x53f   : > { %1299 = vrot.lane.b32.xlu2 %v4837_v7, %s4313_s24 }
 0x547   : > { %1364 = vrot.lane.b32.xlu2 %v4837_v7, %s4314_s15 }
 0x54f   : > { %1392 = vrot.lane.b32.xlu2 %v1178_v1, %s4316_s2 }
 0x557   : > { %1390 = vrot.lane.b32.xlu2 %v1196_v4, %s4316_s2 }
 0x55f   : > { %1535 = vrot.lane.b32.xlu2 %v1180_v39, %s4313_s24 }
 0x567   : > { %1601 = vrot.lane.b32.xlu2 %v1180_v39, %s4314_s15 }
 0x56f   : > { %1666 = vrot.lane.b32.xlu2 %v1180_v39, %s4316_s2 }
 0x577   : > { %1664 = vrot.lane.b32.xlu2 %v1472_v42, %s4316_s2 }
 0x59a   : > { %v1295_v43 = vpop.xlane.xlu2 %1294 }
 0x59b   : > { %3795 = vrcp.f32 %v1295_v43 }
 0x5a1   : > { %v3796_v44 = vpop.eup %3795 }
 0x5a2   : > { %v1297_v45 = vmul.f32 %v3796_v44, %v3794_v36  ;;  %v1300_v46 = vpop.permute.xlu2 %1299 }
 0x5a3   : > { %1320 = vmatpush.msrb.mxu3 %v1300_v46 }
 0x5a4   : > { %3182 = vmatmul.msk.f32.vlgmr.msrb.gmra.mxu3 %vm1224_vm9, %v1297_v45 }
 0x5a5   : > { %3183 = vmatpush.xpose.msk.msra.mxu3 %vm1197_vm7, %v1328_v47 }
 0x5aa   : > { %v1365_v48 = vpop.permute.xlu2 %1364 }
 0x5ab   : > { %1385 = vmatpush.msrb.mxu3 %v1365_v48 }
 0x5ac   : > { %3184 = vmatmul.msk.f32.vlgmr.msra.gmra.mxu3 %vm1197_vm7, %v1326_v49 }
 0x5ad   : > { %3189 = vmatpush.xpose.msk.msra.mxu3 %vm1197_vm7, %v1180_v39 }
 0x5b2   : > { %v1393_v50 = vpop.permute.xlu2 %1392 }
 0x5b3   : > { %3186 = vmatpush.xpose.msk.msrb.mxu0 %vm1197_vm7, %v1393_v50 }
 0x5ba   : > { %v1391_v51 = vpop.permute.xlu2 %1390 }
 0x5bb   : > { %3187 = vmatmul.msk.f32.vlgmr.msrb.gmra.mxu0 %vm1197_vm7, %v1391_v51 }
 0x5c2   : > { %v1536_v52 = vpop.permute.xlu2 %1535 }
 0x5c3   : > { %3192 = vmatpush.xpose.msk.msra.mxu0 %vm1197_vm7, %v1536_v52 }
 0x5ca   : > { %v1602_v53 = vpop.permute.xlu2 %1601 }
 0x5cb   : > { %3195 = vmatpush.xpose.msk.msrb.mxu0 %vm1197_vm7, %v1602_v53 }
 0x5d2   : > { %v1667_v4 = vpop.permute.xlu2 %1666 }
 0x5da   : > { %v1665_v20 = vpop.permute.xlu2 %1664 }
 0x627   : > { %v4877_v54 = vpop.f32.mrf.mxu3 }
 0x62f   : > { %v1350_v55 = vpop.f32.mrf.mxu3 }
 0x630   : > { %v1351_v56 = vadd.f32 %v1350_v55, %v4843_v15 }
 0x632   : > { %v1353_v57 = vsel %vm1224_vm9, %v1351_v56, -inf }
 0x633   : > { %1354 = vmax.xlane.f32.xlu0 %v1353_v57 }
 0x638   : > { %v1415_v58 = vpop.f32.mrf.mxu0 }
 0x639   : > { %v1416_v59 = vadd.f32 %v1415_v58, %v4843_v15 }
 0x63b   : > { %v1418_v60 = vsel %vm1224_vm9, %v1416_v59, -inf }
 0x647   : > { %1533 = vrot.lane.b32.xlu0 %v1472_v42, %s4313_s24 }
 0x671   : > { %1419 = vmax.xlane.f32.xlu0 %v1418_v60 }
 0x6a6   : > { %v1355_v61 = vpop.xlane.xlu0 %1354 }
 0x6a7   : > { %v1356_v62 = vsub.f32 %v1351_v56, %v1355_v61 }
 0x6a9   : > { %v1357_v17 = vmul.f32 1.442695, %v1356_v62 }
 0x6ab   : > { %3797 = vpow2.f32 %v1357_v17 }
 0x6b1   : > { %v3798_v63 = vpop.eup %3797 }
 0x6b2   : > { %v1359_v0 = vsel %vm1224_vm9, %v3798_v63, 0.0 }
 0x6b3   : > { %1360 = vadd.xlane.f32.xlu1 %v1359_v0 }
 0x6b9   : > { %v1534_v1 = vpop.permute.xlu0 %1533 }
 0x6ba   : > { %3193 = vmatmul.msk.f32.vlgmr.msra.gmra.mxu0 %vm1197_vm7, %v1534_v1 }
 0x6bb   : > { %3198 = vmatpush.xpose.msk.msra.mxu0 %vm1197_vm7, %v1667_v4 }
 0x6cc   : > { %1599 = vrot.lane.b32.xlu1 %v1472_v42, %s4314_s15 }
 0x6e4   : > { %v1420_v13 = vpop.xlane.xlu0 %1419 }
 0x6e5   : > { %v1421_v21 = vsub.f32 %v1416_v59, %v1420_v13 }
 0x6e7   : > { %v1422_v22 = vmul.f32 1.442695, %v1421_v21 }
 0x726   : > { %v1361_v6 = vpop.xlane.xlu1 %1360 }
 0x727   : > { %3799 = vrcp.f32 %v1361_v6 }
 0x728   : > { %3801 = vpow2.f32 %v1422_v22 }
 0x72d   : > { %v3800_v9 = vpop.eup %3799 }
 0x72e   : > { %v1363_v11 = vmul.f32 %v3800_v9, %v3798_v63  ;;  %v3802_v33 = vpop.eup %3801 }
 0x72f   : > { %v1424_v36 = vsel %vm1224_vm9, %v3802_v33, 0.0 }
 0x730   : > { %3185 = vmatmul.msk.f32.vlgmr.msrb.gmra.mxu3 %vm1224_vm9, %v1363_v11 }
 0x731   : > { %1528 = vmatpush.msrb.mxu3 %v4890_v12 }
 0x737   : > { %v1558_v14 = vpop.f32.mrf.mxu0 }
 0x738   : > { %v1559_v16 = vadd.f32 %v1558_v14, %v4843_v15  ;;  %3190 = vmatmul.msk.f32.vlgmr.msra.gmra.mxu3 %vm1197_vm7, %v1472_v42  ;;  %v3562_v14 = vld [vmem:[%s4693_s16 + $0x38] sm:$0xff] }
 0x739   : > { %1813 = vmatpush.bf16.msrb.mxu2 %v3562_v14  ;;  %v3333_v14 = vld [vmem:[%s4709_s11 + $0xd0] sm:$0xf0] }
 0x73a   : > { %v1561_v18 = vsel %vm1224_vm9, %v1559_v16, -inf }
 0x73b   : > { %1562 = vmax.xlane.f32.xlu1 %v1561_v18  ;;  %v3560_v18 = vld [vmem:[%s4693_s16 + $0x28] sm:$0xff] }
 0x73e   : > { %v1600_v19 = vpop.permute.xlu1 %1599 }
 0x73f   : > { %3196 = vmatmul.msk.f32.vlgmr.msrb.gmra.mxu0 %vm1197_vm7, %v1600_v19  ;;  %v3559_v19 = vld [vmem:[%s4693_s16 + $0x20] sm:$0xff] }
 0x747   : > { %3199 = vmatmul.msk.f32.vlgmr.msra.gmra.mxu0 %vm1197_vm7, %v1665_v20 }
 0x7ae   : > { %v1563_v23 = vpop.xlane.xlu1 %1562 }
 0x7af   : > { %v1564_v28 = vsub.f32 %v1559_v16, %v1563_v23  ;;  %v3561_v16 = vld [vmem:[%s4693_s16 + $0x30] sm:$0xff] }
 0x7b0   : > { %1814 = vmatpush.bf16.msrb.mxu2 %v3561_v16  ;;  %v3339_v16 = vld [vmem:[%s4709_s11 + $0xc8] sm:$0xf] }
 0x7b1   : > { %v1565_v32 = vmul.f32 1.442695, %v1564_v28  ;;  %v3557_v28 = vld [vmem:[%s4693_s16 + $0x10] sm:$0xff] }
 0x7b3   : > { %v4899_v5 = vpop.f32.mrf.mxu3  ;;  %3803 = vpow2.f32 %v1565_v32 }
 0x7b4   : > { %1815 = vmatpush.bf16.msrb.mxu2 %v3560_v18  ;;  %v3590_v18 = vld [vmem:[%s4709_s11 + $0xd4] sm:$0xf0] }
 0x7b8   : > { %1816 = vmatpush.bf16.msrb.mxu2 %v3559_v19 }
 0x7b9   : > { %v3804_v38 = vpop.eup %3803 }
 0x7ba   : > { %v1567_v39 = vsel %vm1224_vm9, %v3804_v38, 0.0 }
 0x7bb   : > { %v1496_v24 = vpop.f32.mrf.mxu3 }
 0x7bc   : > { %v1497_v25 = vadd.f32 %v1496_v24, %v4843_v15  ;;  %v1624_v26 = vpop.f32.mrf.mxu0 }
 0x7bd   : > { %v1625_v27 = vadd.f32 %v1624_v26, %v4843_v15 }
 0x7be   : > { %v1499_v30 = vsel %vm1224_vm9, %v1497_v25, -inf }
 0x7bf   : > { %1500 = vmax.xlane.f32.xlu2 %v1499_v30  ;;  %v1627_v31 = vsel %vm1224_vm9, %v1625_v27, -inf  ;;  %v3556_v30 = vld [vmem:[%s4693_s16 + $0x8] sm:$0xff] }
 0x7c0   : > { %1628 = vmax.xlane.f32.xlu0 %v1627_v31  ;;  %v3555_v31 = vld [vmem:[%s4693_s16] sm:$0xff] }
 0x7c4   : > { %v1689_v34 = vpop.f32.mrf.mxu0 }
 0x7c5   : > { %v1690_v35 = vadd.f32 %v1689_v34, %v4843_v15 }
 0x7c7   : > { %v1692_v37 = vsel %vm1224_vm9, %v1690_v35, -inf }
 0x7c8   : > { %1425 = vadd.xlane.f32.xlu0 %v1424_v36  ;;  %1693 = vmax.xlane.f32.xlu2 %v1692_v37 }
 0x7d0   : > { %1568 = vadd.xlane.f32.xlu2 %v1567_v39 }
 0x7dc   : > { %1429 = vrot.lane.b32.xlu0 %v4837_v7, %s4316_s2 }
 0x7e4   : > { %1703 = vrot.lane.b32.xlu0 %v4890_v12, %s4316_s2 }
 0x832   : > { %v1501_v40 = vpop.xlane.xlu2 %1500 }
 0x833   : > { %v1629_v41 = vpop.xlane.xlu0 %1628  ;;  %v1502_v42 = vsub.f32 %v1497_v25, %v1501_v40 }
 0x834   : > { %v1630_v15 = vsub.f32 %v1625_v27, %v1629_v41  ;;  %v3558_v27 = vld [vmem:[%s4693_s16 + $0x18] sm:$0xff]  ;;  %s5339_s16 = scalar_lea.vmem [#allocation16], %s4673_s25 }
 0x835   : > { %v1503_v44 = vmul.f32 1.442695, %v1502_v42  ;;  %1817 = vmatpush.bf16.msrb.mxu2 %v3558_v27  ;;  %v3317_v27 = vld [vmem:[%s4709_s11 + $0xb0] sm:$0xf0] }
 0x836   : > { %v1631_v43 = vmul.f32 1.442695, %v1630_v15 }
 0x838   : > { %3805 = vpow2.f32 %v1631_v43 }
 0x839   : > { %3807 = vpow2.f32 %v1503_v44  ;;  %1818 = vmatpush.bf16.msrb.mxu2 %v3557_v28  ;;  %v3323_v28 = vld [vmem:[%s4709_s11 + $0xa8] sm:$0xf] }
 0x83b   : > { %v1694_v45 = vpop.xlane.xlu2 %1693  ;;  %v1426_v7 = vpop.xlane.xlu0 %1425 }
 0x83c   : > { %v1695_v46 = vsub.f32 %v1690_v35, %v1694_v45  ;;  %v3779_v45 = vld [vmem:[%s766_s14] ss:$0 sm:$0xff]  ;;  %s5340_s14 = scalar_lea.vmem [#allocation17], %s4673_s25 }
 0x83d   : > { %1819 = vmatpush.bf16.msrb.mxu2 %v3556_v30  ;;  %v3586_v30 = vld [vmem:[%s4709_s11 + $0xb4] sm:$0xf0] }
 0x83e   : > { %v3806_v47 = vpop.eup %3805  ;;  %v1696_v48 = vmul.f32 1.442695, %v1695_v46 }
 0x83f   : > { %v1633_v49 = vsel %vm1224_vm9, %v3806_v47, 0.0  ;;  %v3808_v50 = vpop.eup %3807 }
 0x840   : > { %3809 = vpow2.f32 %v1696_v48  ;;  %1634 = vadd.xlane.f32.xlu1 %v1633_v49  ;;  %v1505_v52 = vsel %vm1224_vm9, %v3808_v50, 0.0 }
 0x841   : > { %3811 = vrcp.f32 %v1426_v7  ;;  %1820 = vmatpush.bf16.msrb.mxu2 %v3555_v31 }
 0x843   : > { %v1569_v58 = vpop.xlane.xlu2 %1568 }
 0x846   : > { %v3810_v51 = vpop.eup %3809 }
 0x847   : > { %v1698_v53 = vsel %vm1224_vm9, %v3810_v51, 0.0  ;;  %v3812_v55 = vpop.eup %3811 }
 0x848   : > { %1506 = vadd.xlane.f32.xlu1 %v1505_v52  ;;  %1699 = vadd.xlane.f32.xlu2 %v1698_v53  ;;  %v1428_v57 = vmul.f32 %v3812_v55, %v3802_v33 }
 0x84e   : > { %v1430_v56 = vpop.permute.xlu0 %1429 }
 0x84f   : > { %1450 = vmatpush.msrb.mxu1 %v1430_v56 }
 0x850   : > { %3188 = vmatmul.msk.f32.vlgmr.msrb.gmra.mxu1 %vm1224_vm9, %v1428_v57  ;;  %v3347_v57 = vld [vmem:[%s4709_s11 + $0xe0] sm:$0xf] }
 0x856   : > { %v1704_v9 = vpop.permute.xlu0 %1703 }
 0x860   : > { %1638 = vrot.lane.b32.xlu2 %v4890_v12, %s4314_s15 }
 0x861   : > { %1573 = vrot.lane.b32.xlu1 %v4890_v12, %s4313_s24 }
 0x8b3   : > { %v1635_v59 = vpop.xlane.xlu1 %1634 }
 0x8bb   : > { %v1507_v60 = vpop.xlane.xlu1 %1506  ;;  %v1700_v61 = vpop.xlane.xlu2 %1699 }
 0x8bc   : > { %3813 = vrcp.f32 %v1507_v60 }
 0x8bd   : > { %3815 = vrcp.f32 %v1635_v59  ;;  %v3591_v59 = vld [vmem:[%s4709_s11 + $0xe4] sm:$0xf] }
 0x8be   : > { %3817 = vrcp.f32 %v1569_v58  ;;  %v3593_v58 = vld [vmem:[%s4709_s11 + $0xec] sm:$0xf0] }
 0x8bf   : > { %3819 = vrcp.f32 %v1700_v61  ;;  %v3348_v60 = vor.u32 %v3593_v58, %v3347_v57  ;;  %v3349_v61 = vld [vmem:[%s4709_s11 + $0xf0] sm:$0xf0]  ;;  %v3267_v58 = vld [vmem:[%s4709_s11 + $0x40] sm:$0xf] }
 0x8c2   : > { %v3814_v62 = vpop.eup %3813 }
 0x8c3   : > { %v1509_v17 = vmul.f32 %v3814_v62, %v3808_v50  ;;  %v1639_v63 = vpop.permute.xlu2 %1638  ;;  %v3816_v0 = vpop.eup %3815  ;;  %v3355_v62 = vld [vmem:[%s4709_s11 + $0xe8] sm:$0xf] }
 0x8c4   : > { %1659 = vmatpush.msra.mxu3 %v1639_v63  ;;  %v1637_v1 = vmul.f32 %v3816_v0, %v3806_v47  ;;  %v3818_v4 = vpop.eup %3817  ;;  %v3352_v63 = vor.u32 %v3591_v59, %v3349_v61  ;;  %v3573_v59 = vld [vmem:[%s4709_s11 + $0x4c] sm:$0xf0] }
 0x8c5   : > { %3191 = vmatmul.msk.f32.vlgmr.msrb.gmra.mxu3 %vm1224_vm9, %v1509_v17  ;;  %v1571_v6 = vmul.f32 %v3818_v4, %v3804_v38  ;;  %v3820_v11 = vpop.eup %3819  ;;  %v3594_v17 = vld [vmem:[%s4709_s11 + $0xf4] sm:$0xf0]  ;;  %v3357_v4 = vld [vmem:[%s4709_s11 + $0xf8] sm:$0xf0]  ;;  %v3268_v61 = vor.u32 %v3573_v59, %v3267_v58  ;;  %v3781_v59 = vld [vmem:[%s5340_s14] ss:$0 sm:$0xff] }
 0x8c6   : > { %v1702_v12 = vmul.f32 %v3820_v11, %v3810_v51  ;;  %v3356_v0 = vor.u32 %v3594_v17, %v3355_v62  ;;  %2084 = vmatpush.bf16.msrb.mxu3 %v3348_v60  ;;  %2098 = vmatpush.bf16.msrb.mxu0 %v3352_v63  ;;  %v3587_v11 = vld [vmem:[%s4709_s11 + $0xc4] sm:$0xf]  ;;  %v3269_v62 = vld [vmem:[%s4709_s11 + $0x50] sm:$0xf0]  ;;  %v3275_v17 = vld [vmem:[%s4709_s11 + $0x48] sm:$0xf] }
 0x8c7   : > { %v3336_v19 = vor.u32 %v3587_v11, %v3333_v14  ;;  %v3571_v60 = vld [vmem:[%s4709_s11 + $0x44] sm:$0xf]  ;;  %v3574_v63 = vld [vmem:[%s4709_s11 + $0x54] sm:$0xf0]  ;;  %v3569_v11 = vld [vmem:[%s4709_s11 + $0x2c] sm:$0xf0] }
 0x8ca   : > { %2099 = vmatpush.bf16.msrb.mxu0 %v3336_v19  ;;  %v3570_v19 = vld [vmem:[%s4709_s11 + $0x34] sm:$0xf0] }
 0x8cd   : > { %3197 = vmatmul.msk.f32.vlgmr.msra.gmra.mxu3 %vm1224_vm9, %v1637_v1  ;;  %v1452_v13 = vpop.f32.mrf.mxu1  ;;  %v3592_v1 = vld [vmem:[%s4709_s11 + $0xec] sm:$0xf] }
 0x8d3   : > { %v1574_v8 = vpop.permute.xlu1 %1573 }
 0x8d4   : > { %1594 = vmatpush.msra.mxu1 %v1574_v8  ;;  %v3331_v8 = vld [vmem:[%s4709_s11 + $0xc0] sm:$0xf] }
 0x8d5   : > { %3194 = vmatmul.msk.f32.vlgmr.msra.gmra.mxu1 %vm1224_vm9, %v1571_v6  ;;  %v3360_v6 = vor.u32 %v3592_v1, %v3357_v4  ;;  %v3276_v1 = vor.u32 %v3574_v63, %v3275_v17  ;;  %v3572_v4 = vld [vmem:[%s4709_s11 + $0x4c] sm:$0xf] }
 0x8d6   : > { %1724 = vmatpush.msrb.mxu1 %v1704_v9  ;;  %v3589_v9 = vld [vmem:[%s4709_s11 + $0xcc] sm:$0xf0] }
 0x8d7   : > { %2126 = vmatpush.bf16.msra.mxu2 %v3360_v6  ;;  %v3277_v6 = vld [vmem:[%s4709_s11 + $0x58] sm:$0xf0] }
 0x8d8   : > { %2112 = vmatpush.bf16.msra.mxu1 %v3356_v0  ;;  %v3272_v0 = vor.u32 %v3571_v60, %v3269_v62 }
 0x8dd   : > { %3200 = vmatmul.msk.f32.vlgmr.msrb.gmra.mxu1 %vm1224_vm9, %v1702_v12  ;;  %v3332_v12 = vor.u32 %v3589_v9, %v3331_v8  ;;  %v3280_v8 = vor.u32 %v3572_v4, %v3277_v6  ;;  %v3251_v9 = vld [vmem:[%s4709_s11 + $0x20] sm:$0xf] }
 0x8de   : > { %v3252_v14 = vor.u32 %v3569_v11, %v3251_v9 }
 0x8df   : > { %2085 = vmatpush.bf16.msrb.mxu3 %v3332_v12  ;;  %v3567_v12 = vld [vmem:[%s4709_s11 + $0x24] sm:$0xf] }
 0x948   : > { %v1530_v20 = vpop.f32.mrf.mxu3 }
 0x950   : > { %v1661_v21 = vpop.f32.mrf.mxu3 }
 0x951   : > { %v3767_v22 = vpack.i.bf16 %v1661_v21, %v4899_v5  ;;  %v3341_v21 = vld [vmem:[%s4709_s11 + $0xd8] sm:$0xf0] }
 0x952   : > { %v1596_v23 = vpop.f32.mrf.mxu1 }
 0x953   : > { %v3762_v24 = vpack.i.bf16 %v1596_v23, %v4877_v54  ;;  %3768 = vrot.lane.b32.xlu1 %v3767_v22, %s4314_s15  ;;  %v3315_v23 = vld [vmem:[%s4709_s11 + $0xa0] sm:$0xf] }
 0x955   : > { %3763 = vrot.lane.b32.xlu0 %v3762_v24, %s4316_s2  ;;  %v3585_v24 = vld [vmem:[%s4709_s11 + $0xac] sm:$0xf0] }
 0x95a   : > { %v1726_v25 = vpop.f32.mrf.mxu1 }
 0x95b   : > { %v3772_v26 = vpack.i.bf16 %v1726_v25, %v1452_v13  ;;  %v3588_v13 = vld [vmem:[%s4709_s11 + $0xcc] sm:$0xf]  ;;  %v3583_v25 = vld [vmem:[%s4709_s11 + $0xa4] sm:$0xf] }
 0x95c   : > { %v3344_v22 = vor.u32 %v3588_v13, %v3341_v21  ;;  %v3320_v31 = vor.u32 %v3583_v25, %v3317_v27  ;;  %v3565_v27 = vld [vmem:[%s4709_s11 + $0xc] sm:$0xf0] }
 0x95d   : > { %3773 = vrot.lane.b32.xlu0 %v3772_v26, %s4313_s24  ;;  %v3316_v26 = vor.u32 %v3585_v24, %v3315_v23  ;;  %v3261_v23 = vld [vmem:[%s4709_s11 + $0x38] sm:$0xf0]  ;;  %v3235_v24 = vld [vmem:[%s4709_s11] sm:$0xf] }
 0x95e   : > { %2127 = vmatpush.bf16.msra.mxu2 %v3344_v22  ;;  %2100 = vmatpush.bf16.msrb.mxu0 %v3320_v31  ;;  %v3568_v22 = vld [vmem:[%s4709_s11 + $0x2c] sm:$0xf]  ;;  %v3236_v31 = vor.u32 %v3565_v27, %v3235_v24 }
 0x95f   : > { %2086 = vmatpush.bf16.msrb.mxu3 %v3316_v26  ;;  %v3264_v26 = vor.u32 %v3568_v22, %v3261_v23  ;;  %v3616_v27 = vld [vmem:[%s4712_s1 + $0xa8] sm:$0xff] }
 0x9c5   : > { %v3769_v54 = vpop.permute.xlu1 %3768 }
 0x9c6   : > { %v3771_v36 = vunpack.i.h.bf16 %v3769_v54  ;;  %v3770_v37 = vunpack.i.l.bf16 %v3769_v54 }
 0x9c7   : > { %v3764_v5 = vpop.permute.xlu0 %3763 }
 0x9c8   : > { %v3766_v32 = vunpack.i.h.bf16 %v3764_v5  ;;  %v3765_v33 = vunpack.i.l.bf16 %v3764_v5  ;;  %v3324_v5 = vor.u32 %v3586_v30, %v3323_v28  ;;  %v3563_v28 = vld [vmem:[%s4709_s11 + $0x4] sm:$0xf]  ;;  %v3237_v30 = vld [vmem:[%s4709_s11 + $0x10] sm:$0xf0] }
 0x9ca   : > { %v1741_v34 = vsel %vm1197_vm7, %v1530_v20, %v3766_v32  ;;  %v1467_v35 = vsel %vm1197_vm7, %v4850_v29, %v3765_v33  ;;  %v3340_v20 = vor.u32 %v3590_v18, %v3339_v16  ;;  %v3584_v32 = vld [vmem:[%s4709_s11 + $0xac] sm:$0xf]  ;;  %v3325_v33 = vld [vmem:[%s4709_s11 + $0xb8] sm:$0xf0]  ;;  %v3253_v16 = vld [vmem:[%s4709_s11 + $0x30] sm:$0xf0] }
 0x9cb   : > { %v1469_v41 = vsel %vm1468_vm10, %v1467_v35, %v3770_v37  ;;  %v1742_v15 = vsel %vm1468_vm10, %v1741_v34, %v3771_v36  ;;  %v3328_v54 = vor.u32 %v3584_v32, %v3325_v33  ;;  %v3299_v34 = vld [vmem:[%s4709_s11 + $0x80] sm:$0xf]  ;;  %v3581_v35 = vld [vmem:[%s4709_s11 + $0x8c] sm:$0xf0]  ;;  %v3579_v36 = vld [vmem:[%s4709_s11 + $0x84] sm:$0xf]  ;;  %v3256_v13 = vor.u32 %v3567_v12, %v3253_v16 }
 0x9cc   : > { %2113 = vmatpush.bf16.msra.mxu1 %v3340_v20  ;;  %v3300_v37 = vor.u32 %v3581_v35, %v3299_v34  ;;  %v3259_v18 = vld [vmem:[%s4709_s11 + $0x28] sm:$0xf]  ;;  %v3566_v33 = vld [vmem:[%s4709_s11 + $0x14] sm:$0xf0]  ;;  %v3617_v16 = vld [vmem:[%s4712_s1 + $0xb0] sm:$0xff] }
 0x9cd   : > { %2128 = vmatpush.bf16.msra.mxu2 %v3328_v54  ;;  %v3260_v21 = vor.u32 %v3570_v19, %v3259_v18  ;;  %v3243_v32 = vld [vmem:[%s4709_s11 + $0x8] sm:$0xf]  ;;  %v3564_v54 = vld [vmem:[%s4709_s11 + $0xc] sm:$0xf] }
 0x9ce   : > { %2087 = vmatpush.bf16.msrb.mxu3 %v3300_v37  ;;  %v3244_v35 = vor.u32 %v3566_v33, %v3243_v32  ;;  %v3601_v33 = vld [vmem:[%s4712_s1 + $0x30] sm:$0xff] }
 0x9cf   : > { %v3774_v38 = vpop.permute.xlu0 %3773 }
 0x9d0   : > { %v3776_v39 = vunpack.i.h.bf16 %v3774_v38  ;;  %v3775_v40 = vunpack.i.l.bf16 %v3774_v38  ;;  %2114 = vmatpush.bf16.msra.mxu1 %v3324_v5  ;;  %v3301_v38 = vld [vmem:[%s4709_s11 + $0x90] sm:$0xf0]  ;;  %v3240_v5 = vor.u32 %v3563_v28, %v3237_v30 }
 0x9d2   : > { %v1471_v42 = vsel %vm1470_vm11, %v1469_v41, %v3775_v40  ;;  %v1743_v43 = vsel %vm1470_vm11, %v1742_v15, %v3776_v39  ;;  %v3307_v39 = vld [vmem:[%s4709_s11 + $0x88] sm:$0xf]  ;;  %v3582_v40 = vld [vmem:[%s4709_s11 + $0x94] sm:$0xf0]  ;;  %v3304_v41 = vor.u32 %v3579_v36, %v3301_v38  ;;  %v3245_v36 = vld [vmem:[%s4709_s11 + $0x18] sm:$0xf0] }
 0x9d3   : > { %v1744_v44 = vpack.c.bf16 %v1743_v43, %v1471_v42  ;;  %v3308_v15 = vor.u32 %v3582_v40, %v3307_v39  ;;  %v3580_v42 = vld [vmem:[%s4709_s11 + $0x8c] sm:$0xf]  ;;  %v3309_v43 = vld [vmem:[%s4709_s11 + $0x98] sm:$0xf0]  ;;  %v3248_v37 = vor.u32 %v3564_v54, %v3245_v36  ;;  %v3625_v54 = vld [vmem:[%s4712_s1 + $0xf0] sm:$0xff] }
 0x9d4   : > { %2101 = vmatpush.bf16.msrb.mxu0 %v3304_v41 }
 0x9d5   : > { %1821 = vmatmul.bf16.vlgmr.msrb.gmra.mxu2 %v1744_v44  ;;  %v3312_v44 = vor.u32 %v3580_v42, %v3309_v43  ;;  %2115 = vmatpush.bf16.msra.mxu1 %v3308_v15 }
 0x9d7   : > { %2129 = vmatpush.bf16.msra.mxu2 %v3312_v44 }
 0xa58   : > { %v1822_v46 = vpop.f32.mrf.mxu2 }
 0xa59   : > { %v1823_v47 = vadd.f32 %v3779_v45, %v1822_v46  ;;  %v3577_v46 = vld [vmem:[%s4709_s11 + $0x6c] sm:$0xf0] }
 0xa5b   : > { %v4944_v48 = vadd.f32 %v1823_v47, %v4742_v2  ;;  %v3575_v47 = vld [vmem:[%s4709_s11 + $0x64] sm:$0xf] }
 0xa5d   : > { %1831 = vadd.xlane.f32.xlu2 %v4944_v48 }
 0xa60   : > { %v1824_v29 = vpop.f32.mrf.mxu2 }
 0xa61   : > { %v1825_v49 = vadd.f32 %v3779_v45, %v1824_v29  ;;  %v3283_v45 = vld [vmem:[%s4709_s11 + $0x60] sm:$0xf] }
 0xa62   : > { %v3284_v29 = vor.u32 %v3577_v46, %v3283_v45 }
 0xa63   : > { %v4948_v7 = vadd.f32 %v1825_v49, %v4745_v3  ;;  %v3285_v49 = vld [vmem:[%s4709_s11 + $0x70] sm:$0xf0] }
 0xa64   : > { %2088 = vmatpush.bf16.msrb.mxu3 %v3284_v29 }
 0xa65   : > { %1833 = vadd.xlane.f32.xlu1 %v4948_v7 }
 0xa68   : > { %2089 = vmatpush.bf16.msrb.mxu3 %v3268_v61 }
 0xa6c   : > { %2090 = vmatpush.bf16.msrb.mxu3 %v3252_v14  ;;  %v3609_v14 = vld [vmem:[%s4712_s1 + $0x70] sm:$0xff] }
 0xa70   : > { %2091 = vmatpush.bf16.msrb.mxu3 %v3236_v31 }
 0xad0   : > { %v1832_v50 = vpop.xlane.xlu2 %1831 }
 0xad1   : > { %v1835_v51 = vmul.f32 %v1832_v50, %v4748_v10  ;;  %v3291_v50 = vld [vmem:[%s4709_s11 + $0x68] sm:$0xf] }
 0xad3   : > { %v4953_v2 = vsub.f32 %v4944_v48, %v1835_v51  ;;  %v3578_v51 = vld [vmem:[%s4709_s11 + $0x74] sm:$0xf0] }
 0xad5   : > { %v1839_v52 = vmul.f32 %v4953_v2, %v4953_v2 }
 0xad7   : > { %1841 = vadd.xlane.f32.xlu0 %v1839_v52  ;;  %v3288_v52 = vor.u32 %v3575_v47, %v3285_v49 }
 0xad8   : > { %v1834_v53 = vpop.xlane.xlu1 %1833 }
 0xad9   : > { %v1836_v3 = vmul.f32 %v1834_v53, %v4748_v10  ;;  %v3292_v53 = vor.u32 %v3578_v51, %v3291_v50  ;;  %2102 = vmatpush.bf16.msrb.mxu0 %v3288_v52 }
 0xadb   : > { %v4959_v55 = vsub.f32 %v4948_v7, %v1836_v3  ;;  %v3576_v3 = vld [vmem:[%s4709_s11 + $0x6c] sm:$0xf]  ;;  %2116 = vmatpush.bf16.msra.mxu1 %v3292_v53  ;;  %v3780_v53 = vld [vmem:[%s5339_s16] ss:$0 sm:$0xff] }
 0xadd   : > { %v1840_v56 = vmul.f32 %v4959_v55, %v4959_v55  ;;  %2103 = vmatpush.bf16.msrb.mxu0 %v3272_v0 }
 0xadf   : > { %1843 = vadd.xlane.f32.xlu2 %v1840_v56  ;;  %v3293_v56 = vld [vmem:[%s4709_s11 + $0x78] sm:$0xf0]  ;;  %2117 = vmatpush.bf16.msra.mxu1 %v3276_v1 }
 0xae0   : > { %v3296_v57 = vor.u32 %v3576_v3, %v3293_v56  ;;  %v3618_v1 = vld [vmem:[%s4712_s1 + $0xb8] sm:$0xff] }
 0xae1   : > { %2104 = vmatpush.bf16.msrb.mxu0 %v3256_v13  ;;  %v3602_v13 = vld [vmem:[%s4712_s1 + $0x38] sm:$0xff] }
 0xae2   : > { %2130 = vmatpush.bf16.msra.mxu2 %v3296_v57  ;;  %2564 = vmatpush.bf16.msra.mxu3 %v3602_v13  ;;  %v3597_v13 = vld [vmem:[%s4712_s1 + $0x10] sm:$0xff] }
 0xae3   : > { %2118 = vmatpush.bf16.msra.mxu1 %v3260_v21  ;;  %v3626_v21 = vld [vmem:[%s4712_s1 + $0xf8] sm:$0xff] }
 0xae5   : > { %2105 = vmatpush.bf16.msrb.mxu0 %v3240_v5 }
 0xae6   : > { %2131 = vmatpush.bf16.msra.mxu2 %v3280_v8  ;;  %2565 = vmatpush.bf16.msra.mxu3 %v3601_v33 }
 0xae7   : > { %2119 = vmatpush.bf16.msra.mxu1 %v3244_v35 }
 0xaea   : > { %2132 = vmatpush.bf16.msra.mxu2 %v3264_v26  ;;  %v3608_v26 = vld [vmem:[%s4712_s1 + $0x68] sm:$0xff] }
 0xaeb   : > { %2592 = vmatpush.bf16.msrb.mxu1 %v3618_v1 }
 0xaee   : > { %2133 = vmatpush.bf16.msra.mxu2 %v3248_v37 }
 0xaef   : > { %2593 = vmatpush.bf16.msrb.mxu1 %v3617_v16 }
 0xaf2   : > { %2606 = vmatpush.bf16.msrb.mxu2 %v3626_v21 }
 0xaf3   : > { %2594 = vmatpush.bf16.msrb.mxu1 %v3616_v27  ;;  %v3611_v27 = vld [vmem:[%s4712_s1 + $0x80] sm:$0xff] }
 0xaf6   : > { %2607 = vmatpush.bf16.msrb.mxu2 %v3625_v54  ;;  %v3596_v54 = vld [vmem:[%s4712_s1 + $0x8] sm:$0xff] }
 0xb4a   : > { %v1842_v20 = vpop.xlane.xlu0 %1841 }
 0xb4b   : > { %v1845_v25 = vmul.f32 %v1842_v20, %v4748_v10 }
 0xb4d   : > { %v1847_v34 = vadd.f32 1e-05, %v1845_v25 }
 0xb4f   : > { %3821 = vrsqrt.f32 %v1847_v34  ;;  %vm1855_vm13 = vweird.f32 %v1847_v34 }
 0xb52   : > { %v1844_v38 = vpop.xlane.xlu2 %1843 }
 0xb53   : > { %v1846_v39 = vmul.f32 %v1844_v38, %v4748_v10  ;;  %v3607_v38 = vld [vmem:[%s4712_s1 + $0x60] sm:$0xff] }
 0xb55   : > { %v3822_v40 = vpop.eup %3821  ;;  %v1848_v41 = vadd.f32 1e-05, %v1846_v39  ;;  %v3615_v39 = vld [vmem:[%s4712_s1 + $0xa0] sm:$0xff] }
 0xb56   : > { %v1850_v15 = vmul.f32 %v3822_v40, %v1847_v34  ;;  %vm1856_vm12 = vweird.f32 %v3822_v40  ;;  %2595 = vmatpush.bf16.msrb.mxu1 %v3615_v39 }
 0xb57   : > { %3823 = vrsqrt.f32 %v1848_v41  ;;  %vm1857_vm14 = vmor %vm1855_vm13, %vm1856_vm12  ;;  %vm1865_vm0 = vweird.f32 %v1848_v41 }
 0xb58   : > { %v1851_v42 = vmul.f32 %v3822_v40, %v1850_v15 }
 0xb5a   : > { %v1852_v43 = vmul.f32 0.5, %v1851_v42  ;;  %v3600_v42 = vld [vmem:[%s4712_s1 + $0x28] sm:$0xff] }
 0xb5b   : > { %2566 = vmatpush.bf16.msra.mxu3 %v3600_v42 }
 0xb5c   : > { %v1853_v44 = vsub.f32 1.5, %v1852_v43  ;;  %v3624_v43 = vld [vmem:[%s4712_s1 + $0xe8] sm:$0xff] }
 0xb5d   : > { %v3824_v45 = vpop.eup %3823  ;;  %2608 = vmatpush.bf16.msrb.mxu2 %v3624_v43  ;;  %v3595_v43 = vld [vmem:[%s4712_s1] sm:$0xff] }
 0xb5e   : > { %v1854_v46 = vmul.f32 %v3822_v40, %v1853_v44  ;;  %v1860_v47 = vmul.f32 %v3824_v45, %v1848_v41  ;;  %vm1866_vm15 = vweird.f32 %v3824_v45 }
 0xb5f   : > { %vm1867_vm1 = vmor %vm1865_vm0, %vm1866_vm15 }
 0xb60   : > { %v1861_v29 = vmul.f32 %v3824_v45, %v1860_v47  ;;  %v1858_v49 = vsel %vm1857_vm14, %v3822_v40, %v1854_v46 }
 0xb61   : > { %v1869_v52 = vmul.f32 %v1858_v49, %v4953_v2  ;;  %v5036_v2 = vld [vmem:[%s4734_s27] sm:$0xf] }
 0xb62   : > { %v1862_v50 = vmul.f32 0.5, %v1861_v29  ;;  %v1917_v63 = vperm.slane %v5036_v2, 1  ;;  %v1918_v0 = vperm.slane %v5036_v2, 2  ;;  %v1916_v12 = vperm.slane %v5036_v2, 0 }
 0xb63   : > { %v1874_v58 = vmul.f32 %v3780_v53, %v1869_v52  ;;  %v1919_v19 = vperm.slane %v5036_v2, 3  ;;  %v3614_v52 = vld [vmem:[%s4712_s1 + $0x98] sm:$0xff] }
 0xb64   : > { %v1863_v51 = vsub.f32 1.5, %v1862_v50  ;;  %2596 = vmatpush.bf16.msrb.mxu1 %v3614_v52 }
 0xb65   : > { %v1879_v61 = vadd.f32 %v3781_v59, %v1874_v58  ;;  %v3605_v58 = vld [vmem:[%s4712_s1 + $0x50] sm:$0xff] }
 0xb66   : > { %v1864_v3 = vmul.f32 %v3824_v45, %v1863_v51  ;;  %v3606_v51 = vld [vmem:[%s4712_s1 + $0x58] sm:$0xff] }
 0xb68   : > { %v1868_v56 = vsel %vm1867_vm1, %v3824_v45, %v1864_v3  ;;  %v3623_v3 = vld [vmem:[%s4712_s1 + $0xe0] sm:$0xff] }
 0xb69   : > { %v1870_v57 = vmul.f32 %v1868_v56, %v4959_v55  ;;  %v3610_v55 = vld [vmem:[%s4712_s1 + $0x78] sm:$0xff]  ;;  %2609 = vmatpush.bf16.msrb.mxu2 %v3623_v3 }
 0xb6a   : > { %2578 = vmatpush.bf16.msra.mxu0 %v3610_v55 }
 0xb6b   : > { %v1875_v60 = vmul.f32 %v3780_v53, %v1870_v57  ;;  %v3599_v53 = vld [vmem:[%s4712_s1 + $0x20] sm:$0xff] }
 0xb6c   : > { %2567 = vmatpush.bf16.msra.mxu3 %v3599_v53 }
 0xb6d   : > { %v1880_v62 = vadd.f32 %v3781_v59, %v1875_v60  ;;  %v3613_v59 = vld [vmem:[%s4712_s1 + $0x90] sm:$0xff] }
 0xb6e   : > { %2579 = vmatpush.bf16.msra.mxu0 %v3609_v14  ;;  %2597 = vmatpush.bf16.msrb.mxu1 %v3613_v59 }
 0xb6f   : > { %v1881_v17 = vpack.c.bf16 %v1880_v62, %v1879_v61  ;;  %v3598_v62 = vld [vmem:[%s4712_s1 + $0x18] sm:$0xff] }
 0xb70   : > { %2568 = vmatpush.bf16.msra.mxu3 %v3598_v62 }
 0xb71   : > { %2092 = vmatmul.bf16.vlgmr.msrb.gmra.mxu3 %v1881_v17  ;;  %2106 = vmatmul.bf16.vlgmr.msrb.gmra.mxu0 %v1881_v17 }
 0xb72   : > { %2120 = vmatmul.bf16.vlgmr.msra.gmra.mxu1 %v1881_v17  ;;  %2134 = vmatmul.bf16.vlgmr.msra.gmra.mxu2 %v1881_v17  ;;  %v3622_v17 = vld [vmem:[%s4712_s1 + $0xd8] sm:$0xff] }
 0xb73   : > { %2580 = vmatpush.bf16.msra.mxu0 %v3608_v26  ;;  %2610 = vmatpush.bf16.msrb.mxu2 %v3622_v17  ;;  %v3603_v26 = vld [vmem:[%s4712_s1 + $0x40] sm:$0xff] }
 0xb74   : > { %2569 = vmatpush.bf16.msra.mxu3 %v3597_v13 }
 0xb77   : > { %2581 = vmatpush.bf16.msra.mxu0 %v3607_v38 }
 0xb78   : > { %2570 = vmatpush.bf16.msra.mxu3 %v3596_v54 }
 0xb7b   : > { %2582 = vmatpush.bf16.msra.mxu0 %v3606_v51 }
 0xb7c   : > { %2571 = vmatpush.bf16.msra.mxu3 %v3595_v43 }
 0xb7f   : > { %2583 = vmatpush.bf16.msra.mxu0 %v3605_v58 }
 0xbee   : > { %v2107_v4 = vpop.f32.mrf.mxu0 }
 0xbef   : > { %v5042_v6 = vadd.f32 %v2107_v4, %v1917_v63  ;;  %v2121_v8 = vpop.f32.mrf.mxu1  ;;  %v3604_v4 = vld [vmem:[%s4712_s1 + $0x48] sm:$0xff] }
 0xbf0   : > { %v5044_v9 = vadd.f32 %v2121_v8, %v1918_v0  ;;  %v3612_v8 = vld [vmem:[%s4712_s1 + $0x88] sm:$0xff]  ;;  %2584 = vmatpush.bf16.msra.mxu0 %v3604_v4 }
 0xbf1   : > { %v2141_v11 = vmul.f32 -1.702, %v5042_v6  ;;  %2598 = vmatpush.bf16.msrb.mxu1 %v3612_v8 }
 0xbf2   : > { %v2142_v18 = vmul.f32 -1.702, %v5044_v9 }
 0xbf3   : > { %v2150_v20 = vmul.f32 1.442695, %v2141_v11 }
 0xbf4   : > { %v2152_v22 = vmul.f32 1.442695, %v2142_v18  ;;  %v2093_v23 = vpop.f32.mrf.mxu3  ;;  %2585 = vmatpush.bf16.msra.mxu0 %v3603_v26 }
 0xbf5   : > { %3825 = vpow2.f32 %v2150_v20  ;;  %v5054_v24 = vadd.f32 %v2093_v23, %v1916_v12  ;;  %v2135_v25 = vpop.f32.mrf.mxu2  ;;  %2599 = vmatpush.bf16.msrb.mxu1 %v3611_v27 }
 0xbf6   : > { %3827 = vpow2.f32 %v2152_v22  ;;  %v5060_v28 = vadd.f32 %v2135_v25, %v1919_v19  ;;  %v2109_v30 = vpop.f32.mrf.mxu0  ;;  %v3621_v22 = vld [vmem:[%s4712_s1 + $0xd0] sm:$0xff] }
 0xbf7   : > { %v2140_v31 = vmul.f32 -1.702, %v5054_v24  ;;  %v5063_v5 = vadd.f32 %v2109_v30, %v1917_v63  ;;  %v2123_v32 = vpop.f32.mrf.mxu1  ;;  %2611 = vmatpush.bf16.msrb.mxu2 %v3621_v22 }
 0xbf8   : > { %v2143_v34 = vmul.f32 -1.702, %v5060_v28  ;;  %v5068_v35 = vadd.f32 %v2123_v32, %v1918_v0 }
 0xbf9   : > { %v2148_v36 = vmul.f32 1.442695, %v2140_v31  ;;  %v2145_v37 = vmul.f32 -1.702, %v5063_v5 }
 0xbfa   : > { %v2146_v40 = vmul.f32 -1.702, %v5068_v35  ;;  %v2154_v49 = vmul.f32 1.442695, %v2143_v34  ;;  %v3620_v34 = vld [vmem:[%s4712_s1 + $0xc8] sm:$0xff] }
 0xbfb   : > { %v3826_v41 = vpop.eup %3825  ;;  %3829 = vpow2.f32 %v2148_v36  ;;  %v2158_v15 = vmul.f32 1.442695, %v2145_v37  ;;  %2612 = vmatpush.bf16.msrb.mxu2 %v3620_v34 }
 0xbfc   : > { %v3828_v44 = vpop.eup %3827  ;;  %v5076_v45 = vadd.f32 1.0, %v3826_v41  ;;  %v2160_v46 = vmul.f32 1.442695, %v2146_v40  ;;  %v2095_v47 = vpop.f32.mrf.mxu3 }
 0xbfd   : > { %v5078_v29 = vadd.f32 1.0, %v3828_v44  ;;  %3831 = vpow2.f32 %v2158_v15  ;;  %v5080_v50 = vadd.f32 %v2095_v47, %v1916_v12  ;;  %v2137_v20 = vpop.f32.mrf.mxu2  ;;  %v3619_v44 = vld [vmem:[%s4712_s1 + $0xc0] sm:$0xff] }
 0xbfe   : > { %3833 = vrcp.f32 %v5076_v45  ;;  %v5122_v32 = vadd.f32 %v2137_v20, %v1919_v19  ;;  %v2196_v33 = vand.u32 2147483647, %v5076_v45  ;;  %v2198_v36 = vand.u32 2147483648, %v5076_v45 }
 0xbff   : > { %3835 = vrcp.f32 %v5078_v29  ;;  %v2144_v56 = vmul.f32 -1.702, %v5080_v50  ;;  %v2211_v37 = vand.u32 2147483647, %v5078_v29  ;;  %v2213_v40 = vand.u32 2147483648, %v5078_v29  ;;  %2613 = vmatpush.bf16.msrb.mxu2 %v3619_v44 }
 0xc00   : > { %3837 = vpow2.f32 %v2160_v46  ;;  %v2147_v41 = vmul.f32 -1.702, %v5122_v32  ;;  %vm2192_vm3 = vweird.f32 %v5076_v45  ;;  %vm5139_vm4 = vcmp.eq.f32.partialorder %v2196_v33, 8.507059e+37 }
 0xc01   : > { %v3830_v57 = vpop.eup %3829  ;;  %3839 = vpow2.f32 %v2154_v49  ;;  %v2156_v0 = vmul.f32 1.442695, %v2144_v56  ;;  %vm2207_vm5 = vweird.f32 %v5078_v29  ;;  %v2199_v47 = vor.u32 1.1754944e-38, %v2198_v36 }
 0xc02   : > { %v5091_v60 = vadd.f32 1.0, %v3830_v57  ;;  %vm5153_vm8 = vcmp.eq.f32.partialorder %v2211_v37, 8.507059e+37  ;;  %v2214_v57 = vor.u32 1.1754944e-38, %v2213_v40 }
 0xc03   : > { %v3832_v61 = vpop.eup %3831 }
 0xc04   : > { %v5095_v63 = vpop.eup %3833  ;;  %3841 = vrcp.f32 %v5091_v60  ;;  %v5106_v18 = vadd.f32 1.0, %v3832_v61  ;;  %v2162_v61 = vmul.f32 1.442695, %v2147_v41  ;;  %v2183_v37 = vand.u32 2147483648, %v5091_v60 }
 0xc05   : > { %v5098_v55 = vpop.eup %3835  ;;  %v2188_v1 = vmul.f32 %v5095_v63, %v5076_v45  ;;  %3843 = vpow2.f32 %v2156_v0  ;;  %vm2193_vm2 = vweird.f32 %v5095_v63 }
 0xc06   : > { %v3838_v11 = vpop.eup %3837  ;;  %v2203_v12 = vmul.f32 %v5098_v55, %v5078_v29  ;;  %3845 = vrcp.f32 %v5106_v18  ;;  %vm5148_vm6 = vmor %vm2192_vm3, %vm2193_vm2  ;;  %vm2208_vm7 = vweird.f32 %v5098_v55  ;;  %vm2252_vm9 = vweird.f32 %v5106_v18 }
 0xc07   : > { %v3840_v14 = vpop.eup %3839  ;;  %v2189_v16 = vsub.f32 1.0, %v2188_v1  ;;  %v5109_v21 = vadd.f32 1.0, %v3838_v11  ;;  %v2256_v62 = vand.u32 2147483647, %v5106_v18  ;;  %v2258_v17 = vand.u32 2147483648, %v5106_v18  ;;  %vm5177_vm10 = vmor %vm2207_vm5, %vm2208_vm7 }
 0xc08   : > { %v2204_v25 = vsub.f32 1.0, %v2203_v12  ;;  %v5118_v31 = vadd.f32 1.0, %v3840_v14  ;;  %vm2177_vm3 = vweird.f32 %v5091_v60 }
 0xc09   : > { %v2190_v23 = vmul.f32 %v5095_v63, %v2189_v16  ;;  %3847 = vrcp.f32 %v5109_v21  ;;  %v2271_v14 = vand.u32 2147483647, %v5109_v21  ;;  %v2273_v16 = vand.u32 2147483648, %v5109_v21 }
 0xc0a   : > { %v5116_v30 = vpop.eup %3841  ;;  %v2205_v2 = vmul.f32 %v5098_v55, %v2204_v25  ;;  %3849 = vrcp.f32 %v5118_v31  ;;  %vm2257_vm15 = vcmp.eq.f32.partialorder %v2256_v62, 8.507059e+37  ;;  %vm2267_vm0 = vweird.f32 %v5109_v21 }
 0xc0b   : > { %v2191_v38 = vadd.f32 %v5095_v63, %v2190_v23  ;;  %v2173_v19 = vmul.f32 %v5116_v30, %v5091_v60  ;;  %v3844_v39 = vpop.eup %3843  ;;  %vm2178_vm13 = vweird.f32 %v5116_v30  ;;  %v2274_v34 = vor.u32 1.1754944e-38, %v2273_v16 }
 0xc0c   : > { %v3846_v15 = vpop.eup %3845  ;;  %v2206_v53 = vadd.f32 %v5098_v55, %v2205_v2  ;;  %v5162_v56 = vadd.f32 1.0, %v3844_v39  ;;  %vm2272_vm2 = vcmp.eq.f32.partialorder %v2271_v14, 8.507059e+37  ;;  %v2226_v62 = vand.u32 2147483647, %v5118_v31 }
 0xc0d   : > { %v2248_v45 = vmul.f32 %v3846_v15, %v5106_v18  ;;  %v2195_v52 = vsel %vm5148_vm6, %v5095_v63, %v2191_v38  ;;  %v2174_v3 = vsub.f32 1.0, %v2173_v19  ;;  %vm2253_vm11 = vweird.f32 %v3846_v15 }
 0xc0e   : > { %3851 = vrcp.f32 %v5162_v56  ;;  %v2200_v0 = vsel %vm5139_vm4, %v2199_v47, %v2195_v52  ;;  %v2210_v11 = vsel %vm5177_vm10, %v5098_v55, %v2206_v53  ;;  %vm2254_vm14 = vmor %vm2252_vm9, %vm2253_vm11  ;;  %v2259_v55 = vor.u32 1.1754944e-38, %v2258_v17 }
 0xc0f   : > { %v3848_v51 = vpop.eup %3847  ;;  %v2249_v58 = vsub.f32 1.0, %v2248_v45  ;;  %v2175_v12 = vmul.f32 %v5116_v30, %v2174_v3  ;;  %3853 = vpow2.f32 %v2162_v61  ;;  %v2293_v22 = vmul.f32 %v2200_v0, %v5042_v6  ;;  %vm5206_vm4 = vmor %vm2177_vm3, %vm2178_vm13 }
 0xc10   : > { %v2263_v59 = vmul.f32 %v3848_v51, %v5109_v21  ;;  %v5169_v63 = vpop.eup %3849  ;;  %vm2268_vm12 = vweird.f32 %v3848_v51  ;;  %v2215_v27 = vsel %vm5153_vm8, %v2214_v57, %v2210_v11  ;;  %v2181_v21 = vand.u32 2147483647, %v5091_v60 }
 0xc11   : > { %v2250_v4 = vmul.f32 %v3846_v15, %v2249_v58  ;;  %v2218_v29 = vmul.f32 %v5169_v63, %v5118_v31  ;;  %v2176_v33 = vadd.f32 %v5116_v30, %v2175_v12  ;;  %vm2269_vm1 = vmor %vm2267_vm0, %vm2268_vm12  ;;  %v2294_v19 = vmul.f32 %v2215_v27, %v5044_v9 }
 0xc12   : > { %v2264_v8 = vsub.f32 1.0, %v2263_v59  ;;  %v2243_v60 = vand.u32 2147483648, %v5162_v56  ;;  %v2241_v46 = vand.u32 2147483647, %v5162_v56  ;;  %v2184_v47 = vor.u32 1.1754944e-38, %v2183_v37 }
 0xc13   : > { %v2251_v20 = vadd.f32 %v3846_v15, %v2250_v4  ;;  %v2219_v42 = vsub.f32 1.0, %v2218_v29  ;;  %vm2182_vm6 = vcmp.eq.f32.partialorder %v2181_v21, 8.507059e+37  ;;  %vm2237_vm7 = vweird.f32 %v5162_v56 }
 0xc14   : > { %v2265_v13 = vmul.f32 %v3848_v51, %v2264_v8  ;;  %v3852_v26 = vpop.eup %3851  ;;  %vm2242_vm9 = vcmp.eq.f32.partialorder %v2241_v46, 8.507059e+37  ;;  %vm2223_vm10 = vweird.f32 %v5169_v63  ;;  %v2228_v61 = vand.u32 2147483648, %v5118_v31 }
 0xc15   : > { %v2255_v23 = vsel %vm2254_vm14, %v3846_v15, %v2251_v20  ;;  %v2233_v6 = vmul.f32 %v3852_v26, %v5162_v56  ;;  %v3854_v2 = vpop.eup %3853  ;;  %v2180_v15 = vsel %vm5206_vm4, %v5116_v30, %v2176_v33  ;;  %vm2238_vm5 = vweird.f32 %v3852_v26 }
 0xc16   : > { %v2266_v25 = vadd.f32 %v3848_v51, %v2265_v13  ;;  %v2260_v54 = vsel %vm2257_vm15, %v2259_v55, %v2255_v23  ;;  %v2171_v43 = vadd.f32 1.0, %v3854_v2  ;;  %vm2239_vm8 = vmor %vm2237_vm7, %vm2238_vm5  ;;  %v2244_v30 = vor.u32 1.1754944e-38, %v2243_v60 }
 0xc17   : > { %v2297_v18 = vmul.f32 %v2260_v54, %v5063_v5  ;;  %v2234_v41 = vsub.f32 1.0, %v2233_v6  ;;  %v2220_v45 = vmul.f32 %v5169_v63, %v2219_v42  ;;  %vm2222_vm11 = vweird.f32 %v5118_v31 }
 0xc18   : > { %v2270_v36 = vsel %vm2269_vm1, %v3848_v51, %v2266_v25  ;;  %3855 = vrcp.f32 %v2171_v43  ;;  %vm2224_vm12 = vmor %vm2222_vm11, %vm2223_vm10  ;;  %v2288_v0 = vand.u32 2147483648, %v2171_v43  ;;  %v2286_v1 = vand.u32 2147483647, %v2171_v43 }
 0xc19   : > { %v2275_v38 = vsel %vm2272_vm2, %v2274_v34, %v2270_v36  ;;  %v2301_v5 = vpack.c.bf16 %v2297_v18, %v2293_v22  ;;  %v2235_v9 = vmul.f32 %v3852_v26, %v2234_v41  ;;  %v2221_v58 = vadd.f32 %v5169_v63, %v2220_v45 }
 0xc1a   : > { %v2298_v40 = vmul.f32 %v2275_v38, %v5068_v35  ;;  %v2185_v35 = vsel %vm2182_vm6, %v2184_v47, %v2180_v15  ;;  %v2229_v4 = vor.u32 1.1754944e-38, %v2228_v61  ;;  %vm2227_vm14 = vcmp.eq.f32.partialorder %v2226_v62, 8.507059e+37 }
 0xc1b   : > { %2586 = vmatmul.bf16.vlgmr.msra.gmra.mxu0 %v2301_v5  ;;  %v2236_v49 = vadd.f32 %v3852_v26, %v2235_v9  ;;  %v2292_v53 = vmul.f32 %v2185_v35, %v5054_v24  ;;  %v2225_v24 = vsel %vm2224_vm12, %v5169_v63, %v2221_v58  ;;  %vm2282_vm15 = vweird.f32 %v2171_v43  ;;  %v3782_v63 = vld [vmem:[%s909_s0] ss:$0 sm:$0xff]  ;;  %s5352_s0 = sld [smem:[#allocation35_spill]] }
 0xc1c   : > { %v2302_v44 = vpack.c.bf16 %v2298_v40, %v2294_v19  ;;  %v2230_v11 = vsel %vm2227_vm14, %v2229_v4, %v2225_v24  ;;  %v2289_v12 = vor.u32 1.1754944e-38, %v2288_v0  ;;  %vm2287_vm1 = vcmp.eq.f32.partialorder %v2286_v1, 8.507059e+37 }
 0xc1d   : > { %v2240_v51 = vsel %vm2239_vm8, %v3852_v26, %v2236_v49  ;;  %v2295_v16 = vmul.f32 %v2230_v11, %v5060_v28 }
 0xc1e   : > { %2600 = vmatmul.bf16.vlgmr.msrb.gmra.mxu1 %v2302_v44  ;;  %v2245_v52 = vsel %vm2242_vm9, %v2244_v30, %v2240_v51  ;;  %v3856_v57 = vpop.eup %3855 }
 0xc1f   : > { %v2296_v3 = vmul.f32 %v2245_v52, %v5080_v50  ;;  %v2278_v56 = vmul.f32 %v3856_v57, %v2171_v43  ;;  %vm2283_vm13 = vweird.f32 %v3856_v57 }
 0xc20   : > { %vm2284_vm0 = vmor %vm2282_vm15, %vm2283_vm13 }
 0xc21   : > { %v2300_v59 = vpack.c.bf16 %v2296_v3, %v2292_v53  ;;  %v2279_v17 = vsub.f32 1.0, %v2278_v56  ;;  %p3489_p5 = scmp.ne.s32.totalorder %s5352_s0, 1 }
 0xc22   : > { %s5353_s20 = sld [smem:[#allocation46_spill]] (!%p3489_p5) }
 0xc23   : > { %2572 = vmatmul.bf16.vlgmr.msra.gmra.mxu3 %v2300_v59  ;;  %v2280_v50 = vmul.f32 %v3856_v57, %v2279_v17  ;;  %s5354_s22 = sld [smem:[#allocation47_spill]] (!%p3489_p5) }
 0xc24   : > { %s3490_s3 = sld [smem:[#allocation4 + $0x1]] (!%p3489_p5) }
 0xc25   : > { %v2281_v8 = vadd.f32 %v3856_v57, %v2280_v50  ;;  %s2682_s23 = sld [smem:[#allocation4]] (!%p3489_p5) }
 0xc27   : > { %v2285_v14 = vsel %vm2284_vm0, %v3856_v57, %v2281_v8 }
 0xc28   : > { %v2290_v31 = vsel %vm2287_vm1, %v2289_v12, %v2285_v14 }
 0xc29   : > { %v2299_v20 = vmul.f32 %v2290_v31, %v5122_v32 }
 0xc2a   : > { %s2928_s27 = scalar_lea.vmem (!%p3489_p5), [#allocation2], %s3490_s3 }
 0xc2b   : > { %v2303_v13 = vpack.c.bf16 %v2299_v20, %v2295_v16  ;;  %s2683_s19 = scalar_lea.vmem (!%p3489_p5), [#allocation2], %s2682_s23 }
 0xc2d   : > { %2614 = vmatmul.bf16.vlgmr.msrb.gmra.mxu2 %v2303_v13 }
 0xc98   : > { %v2587_v22 = vpop.f32.mrf.mxu0 }
 0xc9b   : > { %v2601_v25 = vpop.f32.mrf.mxu1 }
 0xca0   : > { %v2589_v54 = vpop.f32.mrf.mxu0 }
 0xca3   : > { %v2603_v36 = vpop.f32.mrf.mxu1 }
 0xca6   : > { %v2573_v29 = vpop.f32.mrf.mxu3 }
 0xca7   : > { %v2574_v55 = vadd.f32 %v3782_v63, %v2573_v29 }
 0xca9   : > { %v2588_v23 = vadd.f32 %v2587_v22, %v2574_v55 }
 0xcab   : > { %v2602_v27 = vadd.f32 %v2601_v25, %v2588_v23 }
 0xcae   : > { %v2575_v26 = vpop.f32.mrf.mxu3 }
 0xcaf   : > { %v2576_v33 = vadd.f32 %v3782_v63, %v2575_v26 }
 0xcb0   : > { %v2615_v34 = vpop.f32.mrf.mxu2 }
 0xcb1   : > { %v2616_v28 = vadd.f32 %v2615_v34, %v2602_v27  ;;  %v2590_v18 = vadd.f32 %v2589_v54, %v2576_v33 }
 0xcb3   : > { %v2620_v32 = vadd.f32 %v2616_v28, %v4944_v48  ;;  %v2604_v6 = vadd.f32 %v2603_v36, %v2590_v18 }
 0xcb5   : > { %2622 = vst [vmem:[#allocation2] sm:$0xff] %v2620_v32 }
 0xcb8   : > { %v2617_v21 = vpop.f32.mrf.mxu2 }
 0xcb9   : > { %v2618_v37 = vadd.f32 %v2617_v21, %v2604_v6  ;;  %2627 = sbr.rel (%p3489_p5) target bundleno = 3815 (0xee7), region = 136 }
 0xcbb   : > { %v2621_v38 = vadd.f32 %v2618_v37, %v4948_v7 }
 0xcbd   : > { %2623 = vst [vmem:[#allocation2 + $0x8] sm:$0xff] %v2621_v38 }
 0xcbe   : > { %2630 = vadd.xlane.f32.xlu0 %v2620_v32  ;;  %v3634_v42 = vld [vmem:[#allocation22 + $0x38] sm:$0xff]  ;;  %v3633_v7 = vld [vmem:[#allocation22 + $0x30] sm:$0xff]  ;;  %v3632_v60 = vld [vmem:[#allocation22 + $0x28] sm:$0xff]  ;;  %vm2692_vm8 = vcmask 1040384   ;;  %vm2773_vm9 = vcmask 1041408  }
 0xcbf   : > { %2759 = vmatpush.bf16.msra.mxu0 %v3634_v42  ;;  %v3631_v43 = vld [vmem:[#allocation22 + $0x20] sm:$0xff]  ;;  %v3630_v46 = vld [vmem:[#allocation22 + $0x18] sm:$0xff]  ;;  %v3629_v49 = vld [vmem:[#allocation22 + $0x10] sm:$0xff] }
 0xcc0   : > { %v3628_v35 = vld [vmem:[#allocation22 + $0x8] sm:$0xff]  ;;  %v3627_v53 = vld [vmem:[#allocation22] sm:$0xff]  ;;  %v3858_v50 = vld [vmem:[%s5354_s22] ss:$0 sm:$0xff] }
 0xcc3   : > { %2760 = vmatpush.bf16.msra.mxu0 %v3633_v7 }
 0xcc6   : > { %2632 = vadd.xlane.f32.xlu0 %v2621_v38 }
 0xcc7   : > { %2761 = vmatpush.bf16.msra.mxu0 %v3632_v60 }
 0xccb   : > { %2762 = vmatpush.bf16.msra.mxu0 %v3631_v43 }
 0xccf   : > { %2763 = vmatpush.bf16.msra.mxu0 %v3630_v46 }
 0xcd3   : > { %2764 = vmatpush.bf16.msra.mxu0 %v3629_v49 }
 0xcd7   : > { %2765 = vmatpush.bf16.msra.mxu0 %v3628_v35 }
 0xcdb   : > { %2766 = vmatpush.bf16.msra.mxu0 %v3627_v53 }
 0xd31   : > { %v2631_v2 = vpop.xlane.xlu0 %2630 }
 0xd32   : > { %v2634_v19 = vmul.f32 %v2631_v2, %v4748_v10 }
 0xd34   : > { %v2636_v39 = vsub.f32 %v2620_v32, %v2634_v19 }
 0xd36   : > { %v2638_v5 = vmul.f32 %v2636_v39, %v2636_v39 }
 0xd38   : > { %2640 = vadd.xlane.f32.xlu1 %v2638_v5 }
 0xd39   : > { %v2633_v48 = vpop.xlane.xlu0 %2632 }
 0xd3a   : > { %v2635_v40 = vmul.f32 %v2633_v48, %v4748_v10 }
 0xd3c   : > { %v2637_v41 = vsub.f32 %v2621_v38, %v2635_v40 }
 0xd3e   : > { %v2639_v15 = vmul.f32 %v2637_v41, %v2637_v41 }
 0xd40   : > { %2642 = vadd.xlane.f32.xlu1 %v2639_v15 }
 0xdab   : > { %v2641_v44 = vpop.xlane.xlu1 %2640 }
 0xdac   : > { %v2644_v9 = vmul.f32 %v2641_v44, %v4748_v10 }
 0xdae   : > { %v2646_v47 = vadd.f32 1e-05, %v2644_v9 }
 0xdb0   : > { %3859 = vrsqrt.f32 %v2646_v47  ;;  %vm2654_vm3 = vweird.f32 %v2646_v47 }
 0xdb3   : > { %v2643_v30 = vpop.xlane.xlu1 %2642 }
 0xdb4   : > { %v2645_v45 = vmul.f32 %v2643_v30, %v4748_v10  ;;  %v3857_v10 = vld [vmem:[%s5353_s20] ss:$0 sm:$0xff] }
 0xdb6   : > { %v3860_v51 = vpop.eup %3859  ;;  %v2647_v52 = vadd.f32 1e-05, %v2645_v45 }
 0xdb7   : > { %v2649_v3 = vmul.f32 %v3860_v51, %v2646_v47  ;;  %vm2655_vm2 = vweird.f32 %v3860_v51 }
 0xdb8   : > { %3861 = vrsqrt.f32 %v2647_v52  ;;  %vm2656_vm4 = vmor %vm2654_vm3, %vm2655_vm2  ;;  %vm2664_vm6 = vweird.f32 %v2647_v52 }
 0xdb9   : > { %v2650_v57 = vmul.f32 %v3860_v51, %v2649_v3 }
 0xdbb   : > { %v2651_v58 = vmul.f32 0.5, %v2650_v57 }
 0xdbd   : > { %v2652_v59 = vsub.f32 1.5, %v2651_v58 }
 0xdbe   : > { %v3862_v56 = vpop.eup %3861 }
 0xdbf   : > { %v2653_v61 = vmul.f32 %v3860_v51, %v2652_v59  ;;  %v2659_v62 = vmul.f32 %v3862_v56, %v2647_v52  ;;  %vm2665_vm5 = vweird.f32 %v3862_v56 }
 0xdc0   : > { %vm2666_vm7 = vmor %vm2664_vm6, %vm2665_vm5 }
 0xdc1   : > { %v2657_v17 = vsel %vm2656_vm4, %v3860_v51, %v2653_v61  ;;  %v2660_v0 = vmul.f32 %v3862_v56, %v2659_v62 }
 0xdc2   : > { %v2668_v24 = vmul.f32 %v2657_v17, %v2636_v39 }
 0xdc3   : > { %v2661_v1 = vmul.f32 0.5, %v2660_v0 }
 0xdc4   : > { %v2673_v4 = vmul.f32 %v3857_v10, %v2668_v24 }
 0xdc5   : > { %v2662_v8 = vsub.f32 1.5, %v2661_v1 }
 0xdc6   : > { %v2678_v11 = vadd.f32 %v3858_v50, %v2673_v4 }
 0xdc7   : > { %v2663_v12 = vmul.f32 %v3862_v56, %v2662_v8 }
 0xdc8   : > { %2680 = vst [vmem:[#allocation2] sm:$0xff] %v2678_v11 }
 0xdc9   : > { %v2667_v14 = vsel %vm2666_vm7, %v3862_v56, %v2663_v12 }
 0xdca   : > { %v2669_v31 = vmul.f32 %v2667_v14, %v2637_v41 }
 0xdcc   : > { %v2674_v16 = vmul.f32 %v3857_v10, %v2669_v31 }
 0xdce   : > { %v2679_v20 = vadd.f32 %v3858_v50, %v2674_v16 }
 0xdd0   : > { %2681 = vst [vmem:[#allocation2 + $0x8] sm:$0xff] %v2679_v20 }
 0xdd7   : > { %v3491_v13 = vld [vmem:[%s2928_s27 + $0x8] sm:$0x1]  ;;  %v2684_v29 = vld [vmem:[%s2683_s19] sm:$0x1] }
 0xdd8   : > { %v2690_v63 = vrot.slane %v3491_v13, 7 }
 0xdda   : > { %v2693_v55 = vsel %vm2692_vm8, %v2684_v29, %v2690_v63 }
 0xddb   : > { %v2694_v22 = vpack.c.bf16 %v2693_v55, %v2693_v55 }
 0xddd   : > { %2767 = vmatmul.bf16.vlgmr.msra.gmra.mxu0 %v2694_v22 }
 0xe5a   : > { %v2768_v23 = vpop.f32.mrf.mxu0 }
 0xe5b   : > { %v2772_v25 = vmul.f32 %v2768_v23, %v2768_v23 }
 0xe5d   : > { %v2774_v26 = vsel %vm2773_vm9, %v2772_v25, 0.0 }
 0xe5e   : > { %2775 = vadd.xlane.f32.xlu2 %v2774_v26 }
 0xe62   : > { %v2770_v27 = vpop.f32.mrf.mxu0 }
 0xed1   : > { %v2776_v33 = vpop.xlane.xlu2 %2775 }
 0xed2   : > { %3863 = vrsqrt.f32 %v2776_v33  ;;  %vm2783_vm11 = vweird.f32 %v2776_v33 }
 0xed8   : > { %v3864_v54 = vpop.eup %3863 }
 0xed9   : > { %v2778_v34 = vmul.f32 %v3864_v54, %v2776_v33  ;;  %vm2784_vm10 = vweird.f32 %v3864_v54 }
 0xeda   : > { %vm2785_vm12 = vmor %vm2783_vm11, %vm2784_vm10 }
 0xedb   : > { %v2779_v28 = vmul.f32 %v3864_v54, %v2778_v34 }
 0xedd   : > { %v2780_v18 = vmul.f32 0.5, %v2779_v28 }
 0xedf   : > { %v2781_v32 = vsub.f32 1.5, %v2780_v18 }
 0xee1   : > { %v2782_v36 = vmul.f32 %v3864_v54, %v2781_v32 }
 0xee3   : > { %v2786_v6 = vsel %vm2785_vm12, %v3864_v54, %v2782_v36 }
 0xee4   : > { %v2787_v21 = vmul.f32 %v2786_v6, %v2768_v23 }
 0xee6   : > { %2788 = vst [vmem:[#allocation23] sm:$0x3] %v2787_v21 }
 0xee7 PF: > { %s5355_s26 = sld [smem:[#allocation35_spill]]  ;;  %s4317_s28 = smov [#allocation23]  }
 0xee8   : > { %s2795_s29 = sshll.u32 %s4317_s28, 4  ;;  %s5356_s15 = sld [smem:[#allocation49_spill]]  ;;  %s2796_s29 = int_to_ptr.vmem [resolvable:$true] %s2795_s29 }
 0xeed   : > { %p3711_p8 = scmp.eq.s32.totalorder %s5355_s26, 1 }
 0xeee   : > { %s2797_s2 = sshll.u32 %s5356_s15, 4  ;;  %s2798_s2 = int_to_ptr.hbm [resolvable:$true] %s2797_s2 }
 0xeef   : > { %3668 = dma.vmem_to_hbm [thread:$0]  (%p3711_p8), %s2796_s29, 32, %s2798_s2, [#allocation7]  }
 0xef0   : > { %4282 = dma.done.wait (%p3711_p8), [#allocation7], 32  }
 0xef1   : > { %4284 = vsyncadd (%p3711_p8), [#allocation7], 4294967264 }
 0xef2 PF: > { %s5357_s0 = sld [smem:[#allocation36_spill]] }
 0xef3   : > { %s5358_s28 = sld [smem:[#allocation33_spill]] }
 0xef4   : > { %s5359_s29 = sld [smem:[#allocation34_spill]] }
 0xef5   : > { %s5360_s11 = sld [smem:[#allocation37_spill]] }
 0xef8   : > { %p49_p9 = scmp.ge.s32.totalorder %s5357_s0, 4  }
 0xefa   :  { %51 = sbr.rel (!%p49_p9) target bundleno = 35 (0x23), region = 245 }
 0xeff   :  { %2811 = vsyncpa [#allocation6], 1 }
 0xf00   :  { %2813 = vsyncpa [#allocation6 + $0x1], 1 }
 0xf01   :  { %2814 = vsyncpa [#allocation9], 1 }
 0xf02   :  { %2816 = vsyncpa [#allocation9 + $0x1], 1 }
 0xf03   :  { %2817 = vsyncpa [#allocation12], 1 }
 0xf04   :  { %2819 = vsyncpa [#allocation12 + $0x1], 1 }
 0xf05   :  { %2820 = vsyncpa [#allocation15], 1 }
 0xf06   :  { %2822 = vsyncpa [#allocation15 + $0x1], 1 }
 0xf07   :  { %2823 = vsyncpa [#allocation18], 1 }
 0xf08   :  { %2825 = vsyncpa [#allocation18 + $0x1], 1 }
 0xf09   :  { %2826 = vsyncpa [#allocation21], 1 }
 0xf0a   :  { %2828 = vsyncpa [#allocation21 + $0x1], 1 }
 0xf0b   :  { %2829 = vsyncpa [#allocation7], 1 }
 0xf0c   :  { %2831 = vsyncpa [#allocation7 + $0x1], 1 }

</bundles_post_ra>
